<compile_context>
chip_gen: v7x
topology: tpu7x:2x2x1
jax: 0.10.0
libtpu: 0.0.40
codegen_flags: <defaults>
</compile_context>

<pallas_src>
import math
import functools

import jax
import jax.numpy as jnp
from jax.experimental import pallas as pl
from jax.experimental.pallas import tpu as pltpu


def _layernorm(x, gamma, beta, eps=1e-5):
    mean = jnp.mean(x, axis=-1, keepdims=True)
    var = jnp.mean((x - mean) ** 2, axis=-1, keepdims=True)
    return (x - mean) * jax.lax.rsqrt(var + eps) * gamma + beta


def _new_gelu(x):
    c = math.sqrt(2.0 / math.pi)
    return 0.5 * x * (1.0 + jnp.tanh(c * (x + 0.044715 * x * x * x)))


def encoder_block_kernel(x_ref, wq_ref, wk_ref, wv_ref, wo_ref, bo_ref,
                         wf_ref, bf_ref, wp_ref, bp_ref,
                         g1_ref, b1_ref, g2_ref, b2_ref,
                         o_ref, k_cache, v_cache,
                         *, h, d_Q, d_K, d_V, S, TS, mask):
    s_idx = pl.program_id(1)
    row0 = pl.multiple_of(s_idx * TS, TS)   # global row offset of this q-tile

    # ---- K/V projection: once per batch element (first sequence tile) ----
    # Stored head-major (h, S, d_head) in bf16 so every q-tile reuses them
    # directly in the head-batched attention matmuls.
    @pl.when(s_idx == 0)
    def _():
        x_full = x_ref[0].astype(jnp.bfloat16)                      # (S, D)
        k_all = jnp.dot(x_full, wk_ref[...],
                        preferred_element_type=jnp.float32)         # (S, h*d_K)
        v_all = jnp.dot(x_full, wv_ref[...],
                        preferred_element_type=jnp.float32)         # (S, h*d_V)
        k_cache[...] = jnp.transpose(
            k_all.reshape(S, h, d_K), (1, 0, 2)).astype(jnp.bfloat16)
        v_cache[...] = jnp.transpose(
            v_all.reshape(S, h, d_V), (1, 0, 2)).astype(jnp.bfloat16)

    # ---- query tile ----
    x_tile = x_ref[0, pl.ds(row0, TS), :]                           # (TS, D) f32
    x_bf = x_tile.astype(jnp.bfloat16)

    scale = 1.0 / math.sqrt(d_Q)
    q_all = jnp.dot(x_bf, wq_ref[...],
                    preferred_element_type=jnp.float32) * scale     # (TS, h*d_Q)
    q_h = jnp.transpose(q_all.reshape(TS, h, d_Q),
                        (1, 0, 2)).astype(jnp.bfloat16)             # (h, TS, d_Q)

    # head-batched attention: (h, TS, S) scores against the full cached K/V
    scores = jnp.einsum('hqd,hkd->hqk', q_h, k_cache[...],
                        preferred_element_type=jnp.float32)
    if mask:  # causal: -inf strictly above the (global) diagonal
        rows = jax.lax.broadcasted_iota(jnp.int32, scores.shape, 1) + row0
        cols = jax.lax.broadcasted_iota(jnp.int32, scores.shape, 2)
        scores = jnp.where(cols > rows, -jnp.inf, scores)

    m = jnp.max(scores, axis=-1, keepdims=True)
    e = jnp.exp(scores - m)
    p = e * pl.reciprocal(jnp.sum(e, axis=-1, keepdims=True), approx=True)

    av = jnp.einsum('hqk,hkd->hqd', p.astype(jnp.bfloat16), v_cache[...],
                    preferred_element_type=jnp.float32)             # (h, TS, d_V)
    cat = jnp.transpose(av, (1, 0, 2)).reshape(TS, h * d_V)
    mh = jnp.dot(cat.astype(jnp.bfloat16), wo_ref[...],
                 preferred_element_type=jnp.float32) + bo_ref[...]

    # TODO(synk): nn.Dropout layers are identity here (eval-mode semantics).

    # ---- residual + norm1 (f32 epilogue) ----
    y = x_tile + mh
    y = _layernorm(y, g1_ref[...], b1_ref[...])

    # ---- feed forward (bf16 matmuls, f32 GELU) ----
    hmid = jnp.dot(y.astype(jnp.bfloat16), wf_ref[...],
                   preferred_element_type=jnp.float32) + bf_ref[...]
    hmid = _new_gelu(hmid)
    ff = jnp.dot(hmid.astype(jnp.bfloat16), wp_ref[...],
                 preferred_element_type=jnp.float32) + bp_ref[...]

    # ---- residual + norm2 ----
    y = y + ff
    y = _layernorm(y, g2_ref[...], b2_ref[...])
    o_ref[0] = y.astype(o_ref.dtype)


def encoder_block(x, params, *, h, d_Q, d_K, d_V, mask=False, q_tile=None):
    B, S, D = x.shape
    d_middle = params["wf"].shape[1]
    assert d_Q == d_K, "attention requires d_Q == d_K"

    if q_tile is None:
        q_tile = S if S <= 256 else next(
            (t for t in (256, 128, 64, 32, 16, 8) if S % t == 0), S)
    TS = q_tile
    assert S % TS == 0, "sequence length must be divisible by the q tile"
    nst = S // TS

    # Weights feed the MXU -> store them in bf16 (f32 accumulation in-kernel).
    # In a real model these would already live in bf16.
    wq = params["wq"].astype(jnp.bfloat16)
    wk = params["wk"].astype(jnp.bfloat16)
    wv = params["wv"].astype(jnp.bfloat16)
    wo = params["wo"].astype(jnp.bfloat16)
    wf = params["wf"].astype(jnp.bfloat16)
    wp = params["wp"].astype(jnp.bfloat16)

    kernel = functools.partial(encoder_block_kernel, h=h, d_Q=d_Q, d_K=d_K,
                               d_V=d_V, S=S, TS=TS, mask=mask)

    def full_spec(shape):
        nd = len(shape)
        return pl.BlockSpec(shape, lambda b, s, _n=nd: (0,) * _n)

    in_specs = [
        pl.BlockSpec((1, S, D), lambda b, s: (b, 0, 0)),   # x: full seq per batch
        full_spec(wq.shape), full_spec(wk.shape), full_spec(wv.shape),
        full_spec(wo.shape), full_spec(params["bo"].shape),
        full_spec(wf.shape), full_spec(params["bf"].shape),
        full_spec(wp.shape), full_spec(params["bp"].shape),
        full_spec(params["g1"].shape), full_spec(params["b1"].shape),
        full_spec(params["g2"].shape), full_spec(params["b2"].shape),
    ]

    # Advisory cost estimate so XLA can schedule around the custom call.
    flops = int(
        2 * B * S * D * h * (d_Q + d_K + d_V)      # QKV projections
        + 2 * B * h * S * S * (d_Q + d_V)          # attention
        + 2 * B * S * h * d_V * D                  # output projection
        + 4 * B * S * D * d_middle)                # FFN (two matmuls)
    transcendentals = int(B * h * S * S + B * S * d_middle)
    bytes_accessed = int(
        2 * B * S * D * 4
        + 2 * (wq.size + wk.size + wv.size + wo.size + wf.size + wp.size)
        + 4 * sum(params[k].size for k in ("bo", "bf", "bp",
                                           "g1", "b1", "g2", "b2")))

    # Raise the scoped-VMEM limit relative to the chip's physical capacity
    # (v5e/v6e: 128 MiB, v7x: 64 MiB per TensorCore), leaving headroom.
    try:
        cap = pltpu.get_tpu_info().vmem_capacity_bytes
        vmem_limit = min(int(cap * 3 // 4), 100 * 1024 * 1024)
    except Exception:
        vmem_limit = None

    return pl.pallas_call(
        kernel,
        out_shape=jax.ShapeDtypeStruct((B, S, D), x.dtype),
        grid_spec=pltpu.PrefetchScalarGridSpec(
            num_scalar_prefetch=0,
            grid=(B, nst),
            in_specs=in_specs,
            out_specs=pl.BlockSpec((1, TS, D), lambda b, s: (b, s, 0)),
            scratch_shapes=[
                pltpu.VMEM((h, S, d_K), jnp.bfloat16),   # K cache (per batch)
                pltpu.VMEM((h, S, d_V), jnp.bfloat16),   # V cache (per batch)
            ]),
        compiler_params=pltpu.CompilerParams(
            # seq axis is "arbitrary": it carries the K/V cache across tiles.
            dimension_semantics=("parallel", "arbitrary"),
            vmem_limit_bytes=vmem_limit),
        cost_estimate=pl.CostEstimate(flops=flops,
                                      transcendentals=transcendentals,
                                      bytes_accessed=bytes_accessed),
    )(x, wq, wk, wv, wo, params["bo"], wf, params["bf"], wp, params["bp"],
      params["g1"], params["b1"], params["g2"], params["b2"])


def encoder_block_ref(x, params, *, h, d_Q, d_K, d_V, mask=False):
    """Pure-JAX f32 reference mirroring the PyTorch forward (dropout = identity)."""
    q_all = x @ params["wq"]
    k_all = x @ params["wk"]
    v_all = x @ params["wv"]
    heads = []
    for hi in range(h):
        q = q_all[..., hi * d_Q:(hi + 1) * d_Q]
        k = k_all[..., hi * d_K:(hi + 1) * d_K]
        v = v_all[..., hi * d_V:(hi + 1) * d_V]
        scores = jnp.einsum("bqd,bkd->bqk", q, k) / math.sqrt(d_Q)
        if mask:
            S = scores.shape[-1]
            row = jnp.arange(S)[:, None]
            col = jnp.arange(S)[None, :]
            scores = jnp.where(col > row, -jnp.inf, scores)
        attn = jax.nn.softmax(scores, axis=-1)
        heads.append(jnp.einsum("bqk,bkd->bqd", attn, v))
    cat = jnp.concatenate(heads, axis=-1)
    mh = cat @ params["wo"] + params["bo"]
    y = x + mh
    y = _layernorm(y, params["g1"], params["b1"])
    hmid = _new_gelu(y @ params["wf"] + params["bf"])
    ff = hmid @ params["wp"] + params["bp"]
    y = y + ff
    y = _layernorm(y, params["g2"], params["b2"])
    return y


def init_params(key, d_model, d_middle, h, d_Q, d_K, d_V):
    ks = jax.random.split(key, 8)
    scale = 0.02
    return {
        # per-head projections stacked along the output axis, pre-transposed (in, out)
        "wq": scale * jax.random.normal(ks[0], (d_model, h * d_Q), jnp.float32),
        "wk": scale * jax.random.normal(ks[1], (d_model, h * d_K), jnp.float32),
        "wv": scale * jax.random.normal(ks[2], (d_model, h * d_V), jnp.float32),
        "wo": scale * jax.random.normal(ks[3], (h * d_V, d_model), jnp.float32),
        "bo": scale * jax.random.normal(ks[4], (1, d_model), jnp.float32),
        "wf": scale * jax.random.normal(ks[5], (d_model, d_middle), jnp.float32),
        "bf": scale * jax.random.normal(ks[6], (1, d_middle), jnp.float32),
        "wp": scale * jax.random.normal(ks[7], (d_middle, d_model), jnp.float32),
        "bp": jnp.zeros((1, d_model), jnp.float32),
        # LayerNorm defaults (weight=1, bias=0), eps=1e-5
        "g1": jnp.ones((1, d_model), jnp.float32),
        "b1": jnp.zeros((1, d_model), jnp.float32),
        "g2": jnp.ones((1, d_model), jnp.float32),
        "b2": jnp.zeros((1, d_model), jnp.float32),
    }


if __name__ == "__main__":
    B, S = 2, 16
    d_model, d_middle = 32, 64
    h, d_Q, d_K, d_V = 4, 8, 8, 8

    key = jax.random.PRNGKey(0)
    k_x, k_p = jax.random.split(key)
    x = jax.random.normal(k_x, (B, S, d_model), jnp.float32)
    params = init_params(k_p, d_model, d_middle, h, d_Q, d_K, d_V)

    for mask in (False, True):
        # q_tile=8 -> two sequence tiles per batch element, exercising the
        # persistent K/V cache path and the tiled output writes.
        out = encoder_block(x, params, h=h, d_Q=d_Q, d_K=d_K, d_V=d_V,
                            mask=mask, q_tile=8)
        out = jax.block_until_ready(out)

        ref = encoder_block_ref(x, params, h=h, d_Q=d_Q, d_K=d_K, d_V=d_V,
                                mask=mask)
        assert out.shape == (B, S, d_model)
        err = float(jnp.max(jnp.abs(out - ref)))
        # bf16 MXU operands (f32 accumulation) -> looser tolerance than pure f32.
        assert err < 3e-2, f"mismatch vs pure-JAX reference (mask={mask}): {err}"

    print("KERNEL_OK")
</pallas_src>

<mosaic_0001>
module attributes {stable_mosaic.version = 11 : i64} {
  func.func @encoder_block_kernel(%arg0: i32, %arg1: i32, %arg2: memref<1x16x32xf32, #tpu.memory_space<vmem>>, %arg3: memref<32x32xbf16, #tpu.memory_space<vmem>>, %arg4: memref<32x32xbf16, #tpu.memory_space<vmem>>, %arg5: memref<32x32xbf16, #tpu.memory_space<vmem>>, %arg6: memref<32x32xbf16, #tpu.memory_space<vmem>>, %arg7: memref<1x32xf32, #tpu.memory_space<vmem>>, %arg8: memref<32x64xbf16, #tpu.memory_space<vmem>>, %arg9: memref<1x64xf32, #tpu.memory_space<vmem>>, %arg10: memref<64x32xbf16, #tpu.memory_space<vmem>>, %arg11: memref<1x32xf32, #tpu.memory_space<vmem>>, %arg12: memref<1x32xf32, #tpu.memory_space<vmem>>, %arg13: memref<1x32xf32, #tpu.memory_space<vmem>>, %arg14: memref<1x32xf32, #tpu.memory_space<vmem>>, %arg15: memref<1x32xf32, #tpu.memory_space<vmem>>, %arg16: memref<1x8x32xf32, #tpu.memory_space<vmem>>, %arg17: memref<4x16x8xbf16, #tpu.memory_space<vmem>>, %arg18: memref<4x16x8xbf16, #tpu.memory_space<vmem>>) attributes {dimension_semantics = [#tpu.dimension_semantics<parallel>, #tpu.dimension_semantics<arbitrary>], iteration_bounds = array<i64: 2, 2>, scalar_prefetch = 0 : i64, scratch_operands = 2 : i64, tpu.core_type = #tpu.core_type<tc>, window_params = [{transform_indices = @transform_0, window_bounds = array<i64: 1, 16, 32>}, {pipeline_mode = #tpu.pipeline_mode<synchronous>, transform_indices = @transform_1, window_bounds = array<i64: 32, 32>}, {pipeline_mode = #tpu.pipeline_mode<synchronous>, transform_indices = @transform_2, window_bounds = array<i64: 32, 32>}, {pipeline_mode = #tpu.pipeline_mode<synchronous>, transform_indices = @transform_3, window_bounds = array<i64: 32, 32>}, {pipeline_mode = #tpu.pipeline_mode<synchronous>, transform_indices = @transform_4, window_bounds = array<i64: 32, 32>}, {pipeline_mode = #tpu.pipeline_mode<synchronous>, transform_indices = @transform_5, window_bounds = array<i64: 1, 32>}, {pipeline_mode = #tpu.pipeline_mode<synchronous>, transform_indices = @transform_6, window_bounds = array<i64: 32, 64>}, {pipeline_mode = #tpu.pipeline_mode<synchronous>, transform_indices = @transform_7, window_bounds = array<i64: 1, 64>}, {pipeline_mode = #tpu.pipeline_mode<synchronous>, transform_indices = @transform_8, window_bounds = array<i64: 64, 32>}, {pipeline_mode = #tpu.pipeline_mode<synchronous>, transform_indices = @transform_9, window_bounds = array<i64: 1, 32>}, {pipeline_mode = #tpu.pipeline_mode<synchronous>, transform_indices = @transform_10, window_bounds = array<i64: 1, 32>}, {pipeline_mode = #tpu.pipeline_mode<synchronous>, transform_indices = @transform_11, window_bounds = array<i64: 1, 32>}, {pipeline_mode = #tpu.pipeline_mode<synchronous>, transform_indices = @transform_12, window_bounds = array<i64: 1, 32>}, {pipeline_mode = #tpu.pipeline_mode<synchronous>, transform_indices = @transform_13, window_bounds = array<i64: 1, 32>}, {transform_indices = @transform_14, window_bounds = array<i64: 1, 8, 32>}]} {
    %c8_i32 = arith.constant 8 : i32
    %0 = arith.muli %arg1, %c8_i32 : i32
    %1 = tpu.assume_multiple %0, 8 : i32
    %c0_i32 = arith.constant 0 : i32
    %2 = arith.cmpi eq, %arg1, %c0_i32 : i32
    %3 = arith.extui %2 : i1 to i32
    %c0_i32_0 = arith.constant 0 : i32
    %4 = arith.cmpi ne, %3, %c0_i32_0 : i32
    scf.if %4 {
      %c0_55 = arith.constant 0 : index
      %c0_56 = arith.constant 0 : index
      %c0_57 = arith.constant 0 : index
      %117 = vector.load %arg2[%c0_55, %c0_56, %c0_57] : memref<1x16x32xf32, #tpu.memory_space<vmem>>, vector<1x16x32xf32>
      %118 = vector.shape_cast %117 : vector<1x16x32xf32> to vector<16x32xf32>
      %119 = arith.truncf %118 : vector<16x32xf32> to vector<16x32xbf16>
      %c0_58 = arith.constant 0 : index
      %c0_59 = arith.constant 0 : index
      %120 = vector.load %arg4[%c0_58, %c0_59] : memref<32x32xbf16, #tpu.memory_space<vmem>>, vector<32x32xbf16>
      %cst_60 = arith.constant dense<0.000000e+00> : vector<16x32xf32>
      %121 = tpu.matmul %119, %120, %cst_60 {dimension_numbers = #tpu.dot_dimension_numbers<[1], [0], [0], [1], [0, 0, 1, 1], [], []>} : vector<16x32xbf16>, vector<32x32xbf16>, vector<16x32xf32> -> vector<16x32xf32>
      %c0_61 = arith.constant 0 : index
      %c0_62 = arith.constant 0 : index
      %122 = vector.load %arg5[%c0_61, %c0_62] : memref<32x32xbf16, #tpu.memory_space<vmem>>, vector<32x32xbf16>
      %cst_63 = arith.constant dense<0.000000e+00> : vector<16x32xf32>
      %123 = tpu.matmul %119, %122, %cst_63 {dimension_numbers = #tpu.dot_dimension_numbers<[1], [0], [0], [1], [0, 0, 1, 1], [], []>} : vector<16x32xbf16>, vector<32x32xbf16>, vector<16x32xf32> -> vector<16x32xf32>
      %124 = vector.shape_cast %121 : vector<16x32xf32> to vector<16x4x8xf32>
      %125 = tpu.transpose %124, [1, 0, 2] : vector<16x4x8xf32> -> vector<4x16x8xf32>
      %126 = arith.truncf %125 : vector<4x16x8xf32> to vector<4x16x8xbf16>
      %c0_64 = arith.constant 0 : index
      %c0_65 = arith.constant 0 : index
      %c0_66 = arith.constant 0 : index
      %127 = vector.load %arg17[%c0_64, %c0_65, %c0_66] : memref<4x16x8xbf16, #tpu.memory_space<vmem>>, vector<4x16x8xbf16>
      tpu.vector_store %arg17[%c0_64, %c0_65, %c0_66], %126 {strides = array<i32>} : memref<4x16x8xbf16, #tpu.memory_space<vmem>>, vector<4x16x8xbf16>,
      %128 = vector.shape_cast %123 : vector<16x32xf32> to vector<16x4x8xf32>
      %129 = tpu.transpose %128, [1, 0, 2] : vector<16x4x8xf32> -> vector<4x16x8xf32>
      %130 = arith.truncf %129 : vector<4x16x8xf32> to vector<4x16x8xbf16>
      %c0_67 = arith.constant 0 : index
      %c0_68 = arith.constant 0 : index
      %c0_69 = arith.constant 0 : index
      %131 = vector.load %arg18[%c0_67, %c0_68, %c0_69] : memref<4x16x8xbf16, #tpu.memory_space<vmem>>, vector<4x16x8xbf16>
      tpu.vector_store %arg18[%c0_67, %c0_68, %c0_69], %130 {strides = array<i32>} : memref<4x16x8xbf16, #tpu.memory_space<vmem>>, vector<4x16x8xbf16>,
    } else {
    }
    %c0 = arith.constant 0 : index
    %5 = arith.index_cast %1 : i32 to index
    %c0_1 = arith.constant 0 : index
    %6 = vector.load %arg2[%c0, %5, %c0_1] : memref<1x16x32xf32, #tpu.memory_space<vmem>>, vector<1x8x32xf32>
    %7 = vector.shape_cast %6 : vector<1x8x32xf32> to vector<8x32xf32>
    %8 = arith.truncf %7 : vector<8x32xf32> to vector<8x32xbf16>
    %c0_2 = arith.constant 0 : index
    %c0_3 = arith.constant 0 : index
    %9 = vector.load %arg3[%c0_2, %c0_3] : memref<32x32xbf16, #tpu.memory_space<vmem>>, vector<32x32xbf16>
    %cst = arith.constant dense<0.000000e+00> : vector<8x32xf32>
    %10 = tpu.matmul %8, %9, %cst {dimension_numbers = #tpu.dot_dimension_numbers<[1], [0], [0], [1], [0, 0, 1, 1], [], []>} : vector<8x32xbf16>, vector<32x32xbf16>, vector<8x32xf32> -> vector<8x32xf32>
    %cst_4 = arith.constant 0.353553385 : f32
    %11 = vector.broadcast %cst_4 : f32 to vector<8x32xf32>
    %12 = arith.mulf %10, %11 : vector<8x32xf32>
    %13 = vector.shape_cast %12 : vector<8x32xf32> to vector<8x4x8xf32>
    %14 = tpu.transpose %13, [1, 0, 2] : vector<8x4x8xf32> -> vector<4x8x8xf32>
    %15 = arith.truncf %14 : vector<4x8x8xf32> to vector<4x8x8xbf16>
    %c0_5 = arith.constant 0 : index
    %c0_6 = arith.constant 0 : index
    %c0_7 = arith.constant 0 : index
    %16 = vector.load %arg17[%c0_5, %c0_6, %c0_7] : memref<4x16x8xbf16, #tpu.memory_space<vmem>>, vector<4x16x8xbf16>
    "tpu.trace_start"() <{level = 10 : i32, message = "hqd,hkd->hqk"}> : () -> ()
    %cst_8 = arith.constant dense<0.000000e+00> : vector<4x8x16xf32>
    %17 = tpu.matmul %15, %16, %cst_8 {dimension_numbers = #tpu.dot_dimension_numbers<[2], [2], [1], [1], [0, 0, 0, 1, 1, 1], [0], [0]>} : vector<4x8x8xbf16>, vector<4x16x8xbf16>, vector<4x8x16xf32> -> vector<4x8x16xf32>
    "tpu.trace_stop"() : () -> ()
    %cst_9 = arith.constant dense<0xFF800000> : vector<4x8xf32>
    %18 = vector.multi_reduction <maximumf>, %17, %cst_9 [2] : vector<4x8x16xf32> to vector<4x8xf32>
    %19 = vector.shape_cast %18 : vector<4x8xf32> to vector<4x8x1xf32>
    %20 = vector.broadcast %19 : vector<4x8x1xf32> to vector<4x8x16xf32>
    %21 = arith.subf %17, %20 : vector<4x8x16xf32>
    %22 = math.exp %21 : vector<4x8x16xf32>
    %cst_10 = arith.constant dense<0.000000e+00> : vector<4x8xf32>
    %23 = vector.multi_reduction <add>, %22, %cst_10 [2] : vector<4x8x16xf32> to vector<4x8xf32>
    %24 = vector.shape_cast %23 : vector<4x8xf32> to vector<4x8x1xf32>
    %25 = tpu.reciprocal %24 {approx = true} : vector<4x8x1xf32> -> vector<4x8x1xf32>
    %26 = vector.broadcast %25 : vector<4x8x1xf32> to vector<4x8x16xf32>
    %27 = arith.mulf %22, %26 : vector<4x8x16xf32>
    %28 = arith.truncf %27 : vector<4x8x16xf32> to vector<4x8x16xbf16>
    %c0_11 = arith.constant 0 : index
    %c0_12 = arith.constant 0 : index
    %c0_13 = arith.constant 0 : index
    %29 = vector.load %arg18[%c0_11, %c0_12, %c0_13] : memref<4x16x8xbf16, #tpu.memory_space<vmem>>, vector<4x16x8xbf16>
    "tpu.trace_start"() <{level = 10 : i32, message = "hqk,hkd->hqd"}> : () -> ()
    %cst_14 = arith.constant dense<0.000000e+00> : vector<4x8x8xf32>
    %30 = tpu.matmul %28, %29, %cst_14 {dimension_numbers = #tpu.dot_dimension_numbers<[2], [1], [1], [2], [0, 0, 0, 1, 1, 2], [0], [0]>} : vector<4x8x16xbf16>, vector<4x16x8xbf16>, vector<4x8x8xf32> -> vector<4x8x8xf32>
    "tpu.trace_stop"() : () -> ()
    %31 = tpu.transpose %30, [1, 0, 2] : vector<4x8x8xf32> -> vector<8x4x8xf32>
    %32 = vector.shape_cast %31 : vector<8x4x8xf32> to vector<8x32xf32>
    %33 = arith.truncf %32 : vector<8x32xf32> to vector<8x32xbf16>
    %c0_15 = arith.constant 0 : index
    %c0_16 = arith.constant 0 : index
    %34 = vector.load %arg6[%c0_15, %c0_16] : memref<32x32xbf16, #tpu.memory_space<vmem>>, vector<32x32xbf16>
    %cst_17 = arith.constant dense<0.000000e+00> : vector<8x32xf32>
    %35 = tpu.matmul %33, %34, %cst_17 {dimension_numbers = #tpu.dot_dimension_numbers<[1], [0], [0], [1], [0, 0, 1, 1], [], []>} : vector<8x32xbf16>, vector<32x32xbf16>, vector<8x32xf32> -> vector<8x32xf32>
    %c0_18 = arith.constant 0 : index
    %c0_19 = arith.constant 0 : index
    %36 = vector.load %arg7[%c0_18, %c0_19] : memref<1x32xf32, #tpu.memory_space<vmem>>, vector<1x32xf32>
    %37 = vector.broadcast %36 : vector<1x32xf32> to vector<8x32xf32>
    %38 = arith.addf %35, %37 : vector<8x32xf32>
    %39 = arith.addf %7, %38 : vector<8x32xf32>
    %c0_20 = arith.constant 0 : index
    %c0_21 = arith.constant 0 : index
    %40 = vector.load %arg12[%c0_20, %c0_21] : memref<1x32xf32, #tpu.memory_space<vmem>>, vector<1x32xf32>
    %c0_22 = arith.constant 0 : index
    %c0_23 = arith.constant 0 : index
    %41 = vector.load %arg13[%c0_22, %c0_23] : memref<1x32xf32, #tpu.memory_space<vmem>>, vector<1x32xf32>
    %cst_24 = arith.constant dense<0.000000e+00> : vector<8xf32>
    %42 = vector.multi_reduction <add>, %39, %cst_24 [1] : vector<8x32xf32> to vector<8xf32>
    %43 = vector.shape_cast %42 : vector<8xf32> to vector<8x1xf32>
    %cst_25 = arith.constant 3.200000e+01 : f32
    %44 = vector.broadcast %cst_25 : f32 to vector<8x1xf32>
    %45 = arith.divf %43, %44 : vector<8x1xf32>
    %46 = vector.broadcast %45 : vector<8x1xf32> to vector<8x32xf32>
    %47 = arith.subf %39, %46 : vector<8x32xf32>
    %48 = arith.mulf %47, %47 : vector<8x32xf32>
    %cst_26 = arith.constant dense<0.000000e+00> : vector<8xf32>
    %49 = vector.multi_reduction <add>, %48, %cst_26 [1] : vector<8x32xf32> to vector<8xf32>
    %50 = vector.shape_cast %49 : vector<8xf32> to vector<8x1xf32>
    %cst_27 = arith.constant 3.200000e+01 : f32
    %51 = vector.broadcast %cst_27 : f32 to vector<8x1xf32>
    %52 = arith.divf %50, %51 : vector<8x1xf32>
    %53 = vector.broadcast %45 : vector<8x1xf32> to vector<8x32xf32>
    %54 = arith.subf %39, %53 : vector<8x32xf32>
    %cst_28 = arith.constant 9.99999974E-6 : f32
    %55 = vector.broadcast %cst_28 : f32 to vector<8x1xf32>
    %56 = arith.addf %52, %55 : vector<8x1xf32>
    %57 = math.rsqrt %56 : vector<8x1xf32>
    %58 = vector.broadcast %57 : vector<8x1xf32> to vector<8x32xf32>
    %59 = arith.mulf %54, %58 : vector<8x32xf32>
    %60 = vector.broadcast %40 : vector<1x32xf32> to vector<8x32xf32>
    %61 = arith.mulf %59, %60 : vector<8x32xf32>
    %62 = vector.broadcast %41 : vector<1x32xf32> to vector<8x32xf32>
    %63 = arith.addf %61, %62 : vector<8x32xf32>
    %64 = arith.truncf %63 : vector<8x32xf32> to vector<8x32xbf16>
    %c0_29 = arith.constant 0 : index
    %c0_30 = arith.constant 0 : index
    %65 = vector.load %arg8[%c0_29, %c0_30] : memref<32x64xbf16, #tpu.memory_space<vmem>>, vector<32x64xbf16>
    %cst_31 = arith.constant dense<0.000000e+00> : vector<8x64xf32>
    %66 = tpu.matmul %64, %65, %cst_31 {dimension_numbers = #tpu.dot_dimension_numbers<[1], [0], [0], [1], [0, 0, 1, 1], [], []>} : vector<8x32xbf16>, vector<32x64xbf16>, vector<8x64xf32> -> vector<8x64xf32>
    %c0_32 = arith.constant 0 : index
    %c0_33 = arith.constant 0 : index
    %67 = vector.load %arg9[%c0_32, %c0_33] : memref<1x64xf32, #tpu.memory_space<vmem>>, vector<1x64xf32>
    %68 = vector.broadcast %67 : vector<1x64xf32> to vector<8x64xf32>
    %69 = arith.addf %66, %68 : vector<8x64xf32>
    %cst_34 = arith.constant 5.000000e-01 : f32
    %70 = vector.broadcast %cst_34 : f32 to vector<8x64xf32>
    %71 = arith.mulf %70, %69 : vector<8x64xf32>
    %cst_35 = arith.constant 4.471500e-02 : f32
    %72 = vector.broadcast %cst_35 : f32 to vector<8x64xf32>
    %73 = arith.mulf %72, %69 : vector<8x64xf32>
    %74 = arith.mulf %73, %69 : vector<8x64xf32>
    %75 = arith.mulf %74, %69 : vector<8x64xf32>
    %76 = arith.addf %69, %75 : vector<8x64xf32>
    %cst_36 = arith.constant 0.797884583 : f32
    %77 = vector.broadcast %cst_36 : f32 to vector<8x64xf32>
    %78 = arith.mulf %77, %76 : vector<8x64xf32>
    %79 = math.tanh %78 : vector<8x64xf32>
    %cst_37 = arith.constant 1.000000e+00 : f32
    %80 = vector.broadcast %cst_37 : f32 to vector<8x64xf32>
    %81 = arith.addf %80, %79 : vector<8x64xf32>
    %82 = arith.mulf %71, %81 : vector<8x64xf32>
    %83 = arith.truncf %82 : vector<8x64xf32> to vector<8x64xbf16>
    %c0_38 = arith.constant 0 : index
    %c0_39 = arith.constant 0 : index
    %84 = vector.load %arg10[%c0_38, %c0_39] : memref<64x32xbf16, #tpu.memory_space<vmem>>, vector<64x32xbf16>
    %cst_40 = arith.constant dense<0.000000e+00> : vector<8x32xf32>
    %85 = tpu.matmul %83, %84, %cst_40 {dimension_numbers = #tpu.dot_dimension_numbers<[1], [0], [0], [1], [0, 0, 1, 1], [], []>} : vector<8x64xbf16>, vector<64x32xbf16>, vector<8x32xf32> -> vector<8x32xf32>
    %c0_41 = arith.constant 0 : index
    %c0_42 = arith.constant 0 : index
    %86 = vector.load %arg11[%c0_41, %c0_42] : memref<1x32xf32, #tpu.memory_space<vmem>>, vector<1x32xf32>
    %87 = vector.broadcast %86 : vector<1x32xf32> to vector<8x32xf32>
    %88 = arith.addf %85, %87 : vector<8x32xf32>
    %89 = arith.addf %63, %88 : vector<8x32xf32>
    %c0_43 = arith.constant 0 : index
    %c0_44 = arith.constant 0 : index
    %90 = vector.load %arg14[%c0_43, %c0_44] : memref<1x32xf32, #tpu.memory_space<vmem>>, vector<1x32xf32>
    %c0_45 = arith.constant 0 : index
    %c0_46 = arith.constant 0 : index
    %91 = vector.load %arg15[%c0_45, %c0_46] : memref<1x32xf32, #tpu.memory_space<vmem>>, vector<1x32xf32>
    %cst_47 = arith.constant dense<0.000000e+00> : vector<8xf32>
    %92 = vector.multi_reduction <add>, %89, %cst_47 [1] : vector<8x32xf32> to vector<8xf32>
    %93 = vector.shape_cast %92 : vector<8xf32> to vector<8x1xf32>
    %cst_48 = arith.constant 3.200000e+01 : f32
    %94 = vector.broadcast %cst_48 : f32 to vector<8x1xf32>
    %95 = arith.divf %93, %94 : vector<8x1xf32>
    %96 = vector.broadcast %95 : vector<8x1xf32> to vector<8x32xf32>
    %97 = arith.subf %89, %96 : vector<8x32xf32>
    %98 = arith.mulf %97, %97 : vector<8x32xf32>
    %cst_49 = arith.constant dense<0.000000e+00> : vector<8xf32>
    %99 = vector.multi_reduction <add>, %98, %cst_49 [1] : vector<8x32xf32> to vector<8xf32>
    %100 = vector.shape_cast %99 : vector<8xf32> to vector<8x1xf32>
    %cst_50 = arith.constant 3.200000e+01 : f32
    %101 = vector.broadcast %cst_50 : f32 to vector<8x1xf32>
    %102 = arith.divf %100, %101 : vector<8x1xf32>
    %103 = vector.broadcast %95 : vector<8x1xf32> to vector<8x32xf32>
    %104 = arith.subf %89, %103 : vector<8x32xf32>
    %cst_51 = arith.constant 9.99999974E-6 : f32
    %105 = vector.broadcast %cst_51 : f32 to vector<8x1xf32>
    %106 = arith.addf %102, %105 : vector<8x1xf32>
    %107 = math.rsqrt %106 : vector<8x1xf32>
    %108 = vector.broadcast %107 : vector<8x1xf32> to vector<8x32xf32>
    %109 = arith.mulf %104, %108 : vector<8x32xf32>
    %110 = vector.broadcast %90 : vector<1x32xf32> to vector<8x32xf32>
    %111 = arith.mulf %109, %110 : vector<8x32xf32>
    %112 = vector.broadcast %91 : vector<1x32xf32> to vector<8x32xf32>
    %113 = arith.addf %111, %112 : vector<8x32xf32>
    %c0_52 = arith.constant 0 : index
    %c0_53 = arith.constant 0 : index
    %c0_54 = arith.constant 0 : index
    %114 = vector.load %arg16[%c0_52, %c0_53, %c0_54] : memref<1x8x32xf32, #tpu.memory_space<vmem>>, vector<1x8x32xf32>
    %115 = vector.shape_cast %114 : vector<1x8x32xf32> to vector<8x32xf32>
    %116 = vector.shape_cast %113 : vector<8x32xf32> to vector<1x8x32xf32>
    tpu.vector_store %arg16[%c0_52, %c0_53, %c0_54], %116 {strides = array<i32>} : memref<1x8x32xf32, #tpu.memory_space<vmem>>, vector<1x8x32xf32>,
    return
  }
  func.func @transform_0(%arg0: i32, %arg1: i32) -> (i32, i32, i32) {
    %c0_i32 = arith.constant 0 : i32
    %c0_i32_0 = arith.constant 0 : i32
    %c0_i32_1 = arith.constant 0 : i32
    return %arg0, %c0_i32, %c0_i32_0 : i32, i32, i32
  }
  func.func @transform_1(%arg0: i32, %arg1: i32) -> (i32, i32) {
    %c0_i32 = arith.constant 0 : i32
    %c0_i32_0 = arith.constant 0 : i32
    %c0_i32_1 = arith.constant 0 : i32
    return %c0_i32, %c0_i32_0 : i32, i32
  }
  func.func @transform_2(%arg0: i32, %arg1: i32) -> (i32, i32) {
    %c0_i32 = arith.constant 0 : i32
    %c0_i32_0 = arith.constant 0 : i32
    %c0_i32_1 = arith.constant 0 : i32
    return %c0_i32, %c0_i32_0 : i32, i32
  }
  func.func @transform_3(%arg0: i32, %arg1: i32) -> (i32, i32) {
    %c0_i32 = arith.constant 0 : i32
    %c0_i32_0 = arith.constant 0 : i32
    %c0_i32_1 = arith.constant 0 : i32
    return %c0_i32, %c0_i32_0 : i32, i32
  }
  func.func @transform_4(%arg0: i32, %arg1: i32) -> (i32, i32) {
    %c0_i32 = arith.constant 0 : i32
    %c0_i32_0 = arith.constant 0 : i32
    %c0_i32_1 = arith.constant 0 : i32
    return %c0_i32, %c0_i32_0 : i32, i32
  }
  func.func @transform_5(%arg0: i32, %arg1: i32) -> (i32, i32) {
    %c0_i32 = arith.constant 0 : i32
    %c0_i32_0 = arith.constant 0 : i32
    %c0_i32_1 = arith.constant 0 : i32
    return %c0_i32, %c0_i32_0 : i32, i32
  }
  func.func @transform_6(%arg0: i32, %arg1: i32) -> (i32, i32) {
    %c0_i32 = arith.constant 0 : i32
    %c0_i32_0 = arith.constant 0 : i32
    %c0_i32_1 = arith.constant 0 : i32
    return %c0_i32, %c0_i32_0 : i32, i32
  }
  func.func @transform_7(%arg0: i32, %arg1: i32) -> (i32, i32) {
    %c0_i32 = arith.constant 0 : i32
    %c0_i32_0 = arith.constant 0 : i32
    %c0_i32_1 = arith.constant 0 : i32
    return %c0_i32, %c0_i32_0 : i32, i32
  }
  func.func @transform_8(%arg0: i32, %arg1: i32) -> (i32, i32) {
    %c0_i32 = arith.constant 0 : i32
    %c0_i32_0 = arith.constant 0 : i32
    %c0_i32_1 = arith.constant 0 : i32
    return %c0_i32, %c0_i32_0 : i32, i32
  }
  func.func @transform_9(%arg0: i32, %arg1: i32) -> (i32, i32) {
    %c0_i32 = arith.constant 0 : i32
    %c0_i32_0 = arith.constant 0 : i32
    %c0_i32_1 = arith.constant 0 : i32
    return %c0_i32, %c0_i32_0 : i32, i32
  }
  func.func @transform_10(%arg0: i32, %arg1: i32) -> (i32, i32) {
    %c0_i32 = arith.constant 0 : i32
    %c0_i32_0 = arith.constant 0 : i32
    %c0_i32_1 = arith.constant 0 : i32
    return %c0_i32, %c0_i32_0 : i32, i32
  }
  func.func @transform_11(%arg0: i32, %arg1: i32) -> (i32, i32) {
    %c0_i32 = arith.constant 0 : i32
    %c0_i32_0 = arith.constant 0 : i32
    %c0_i32_1 = arith.constant 0 : i32
    return %c0_i32, %c0_i32_0 : i32, i32
  }
  func.func @transform_12(%arg0: i32, %arg1: i32) -> (i32, i32) {
    %c0_i32 = arith.constant 0 : i32
    %c0_i32_0 = arith.constant 0 : i32
    %c0_i32_1 = arith.constant 0 : i32
    return %c0_i32, %c0_i32_0 : i32, i32
  }
  func.func @transform_13(%arg0: i32, %arg1: i32) -> (i32, i32) {
    %c0_i32 = arith.constant 0 : i32
    %c0_i32_0 = arith.constant 0 : i32
    %c0_i32_1 = arith.constant 0 : i32
    return %c0_i32, %c0_i32_0 : i32, i32
  }
  func.func @transform_14(%arg0: i32, %arg1: i32) -> (i32, i32, i32) {
    %c0_i32 = arith.constant 0 : i32
    %c0_i32_0 = arith.constant 0 : i32
    return %arg0, %arg1, %c0_i32 : i32, i32, i32
  }
}

</mosaic_0001>

<bundles_post_ra>
// kernel: tpu_custom_call.1
= control target key start
LH: loop header
LB: loop body
LE: loop exit
PB: predicated region body
PF: predicated region fallthrough
CT: control target
= control target key end

     0   :  { %s3719_s0 = inlined_call_operand.vmem [shape: f32[2,16,32], index: 0, kind: input, shape index: {}]   ;;  %s3720_s1 = inlined_call_operand.vmem [shape: bf16[32,32], index: 1, kind: input, shape index: {}]   ;;  %s3721_s2 = inlined_call_operand.hbm [shape: bf16[32,32], index: 2, kind: input, shape index: {}]   ;;  %s3722_s3 = inlined_call_operand.hbm [shape: bf16[32,32], index: 3, kind: input, shape index: {}]   ;;  %s3723_s4 = inlined_call_operand.hbm [shape: bf16[32,32], index: 4, kind: input, shape index: {}]   ;;  %s3724_s5 = inlined_call_operand.vmem [shape: f32[1,32], index: 5, kind: input, shape index: {}]   ;;  %s3725_s6 = inlined_call_operand.hbm [shape: bf16[32,64], index: 6, kind: input, shape index: {}]   ;;  %s3726_s7 = inlined_call_operand.vmem [shape: f32[1,64], index: 7, kind: input, shape index: {}]   ;;  %s3727_s8 = inlined_call_operand.vmem [shape: bf16[64,32], index: 8, kind: input, shape index: {}]   ;;  %s3728_s9 = inlined_call_operand.vmem [shape: f32[1,32], index: 9, kind: input, shape index: {}]   ;;  %s3729_s10 = inlined_call_operand.vmem [shape: f32[1,32], index: 10, kind: input, shape index: {}]   ;;  %s3730_s11 = inlined_call_operand.vmem [shape: f32[1,32], index: 11, kind: input, shape index: {}]   ;;  %s3731_s12 = inlined_call_operand.vmem [shape: f32[1,32], index: 12, kind: input, shape index: {}]   ;;  %s3732_s13 = inlined_call_operand.vmem [shape: f32[1,32], index: 13, kind: input, shape index: {}]   ;;  %s3733_s14 = inlined_call_operand.hbm [shape: f32[2,16,32], index: 14, kind: output, shape index: {}]  }
   0x1   :  { %3750 = sst [smem:[#allocation27_spill]] %s3726_s7 }
   0x2   :  { %3751 = sst [smem:[#allocation28_spill]] %s3728_s9 }
   0x3   :  { %3752 = sst [smem:[#allocation29_spill]] %s3731_s12 }
   0x4   :  { %3753 = sst [smem:[#allocation30_spill]] %s3732_s13 }
   0x5   :  { %3754 = sst [smem:[#allocation31_spill]] %s3733_s14 }
   0x6   :  { %19 = vsyncpa [#allocation5], 0 }
   0x7   :  { %20 = vsyncpa [#allocation8], 0 }
   0x8   :  { %21 = vsyncpa [#allocation11], 0 }
   0x9   :  { %22 = vsyncpa [#allocation6], 0 }
   0xa   :  { %24 = vsyncpa [#allocation6 + $0x1], 0  ;;  %s3160_s29 = smov 0   ;;  %s3162_s30 = smov 0  }
   0xb   :  { %s3164_s15 = smov 0   ;;  %s3166_s16 = smov 0  }
   0xc   :  { %s3168_s17 = smov 0   ;;  %s3170_s18 = smov 0  }
   0xd   :  { %s3172_s19 = smov 0   ;;  %s3174_s20 = smov 0  }
   0xe LB: > { %3755 = sst [smem:[#allocation17_spill]] %s3031_s29  ;;  %s2467_s21 = sadd.s32 4294967295, %s3059_s20   ;;  %s3059_s20 = sphi %s3174_s20, %s30_s20   ;;  %s3055_s19 = sphi %s3172_s19, %s3790_s19   ;;  %s3051_s18 = sphi %s3170_s18, %s3789_s18   ;;  %s3047_s17 = sphi %s3168_s17, %s3788_s17   ;;  %s3043_s16 = sphi %s3166_s16, %s3787_s16   ;;  %s3039_s15 = sphi %s3164_s15, %s3786_s15   ;;  %s3035_s30 = sphi %s3162_s30, %s3792_s30   ;;  %s3031_s29 = sphi %s3160_s29, %s3791_s29  }
   0xf   : > { %3756 = sst [smem:[#allocation18_spill]] %s3039_s15  ;;  %s2468_s22 = sadd.s32 4294967294, %s3059_s20  }
  0x10   : > { %3757 = sst [smem:[#allocation19_spill]] %s3051_s18  ;;  %s39_s23 = sadd.s32 1, %s3051_s18 }
  0x11   : > { %3758 = sst [smem:[#allocation20_spill]] %s3055_s19  ;;  %s42_s24 = sadd.s32 1, %s3055_s19 }
  0x12   : > { %3759 = sst [smem:[#allocation21_spill]] %s3059_s20  ;;  %p40_p0 = scmp.ge.s32.totalorder %s39_s23, 2 }
  0x13   : > { %s350_s25 = sadd.s32 1, %s3039_s15  ;;  %p360_p1 = scmp.ne.s32.totalorder %s3039_s15, %s3035_s30 }
  0x14   : > { %p361_p2 = scmp.eq.s32.totalorder %s2467_s21, 3  ;;  %s3794_s23 = smov (%p40_p0, %s39_s23), 0 }
  0x15   : > { %3760 = sst [smem:[#allocation22_spill]] %s3794_s23  ;;  %s3796_s24 = smov (!%p40_p0, %s42_s24), %s3055_s19 }
  0x16   : > { %s346_s26 = ssub.s32 %s3051_s18, %s3794_s23  ;;  %p3212_p3 = por %p361_p2, %p360_p1 }
  0x17   : > { %p44_p4 = scmp.ge.s32.totalorder %s3796_s24, 2  ;;  %p366_p5 = scmp.ne.s32.totalorder %s3035_s30, %s3031_s29 }
  0x18   : > { %s3761_s27 = scalar_select %p3212_p3, 1, 0 }
  0x19   : > { %p367_p6 = scmp.eq.s32.totalorder %s2468_s22, 3  ;;  %p2469_p7 = scmp.ge.s32.totalorder %s3059_s20, 1 }
  0x1a   : > { %3762 = sst [smem:[#allocation23_spill]] %s3761_s27  ;;  %s3798_s24 = smov (%p44_p4, %s3796_s24), 0 }
  0x1b   : > { %3763 = sst [smem:[#allocation24_spill]] %s3798_s24  ;;  %p3221_p8 = por %p367_p6, %p366_p5 }
  0x1c   : > { %p374_p9 = scmp.lt.s32.totalorder %s3059_s20, 5  ;;  %s345_s14 = ssub.s32 %s3055_s19, %s3798_s24 }
  0x1d   : > { %s3764_s28 = scalar_select %p3221_p8, 1, 0 }
  0x1e   : > { %s347_s13 = sor.u32 %s346_s26, %s345_s14  ;;  %p3228_p10 = pnand %p2469_p7, %p374_p9 }
  0x1f   : > { %3765 = sst [smem:[#allocation25_spill]] %s3764_s28  ;;  %p348_p11 = scmp.eq.s32.totalorder %s347_s13, 0 }
  0x20   : > { %s3766_s23 = scalar_select %p3228_p10, 1, 0 }
  0x21   : > { %p3232_p12 = scmp.eq.s32.totalorder %s2467_s21, 0  ;;  %p2692_p13 = pneg %p3228_p10 }
  0x22   : > { %s3239_s22 = scalar_select %p348_p11, %s3039_s15, %s350_s25  }
  0x23   : > { %s3767_s18 = scalar_select %p3232_p12, 1, 0 }
  0x24   : > { %3768 = sst [smem:[#allocation26_spill]] %s3239_s22  ;;  %p3243_p0 = pnand %p3232_p12, %p2692_p13 }
  0x25   : > { %s3061_s14 = smov [#allocation7]   ;;  %s2841_s21 = scalar_lea.hbm %s3722_s3, 256 }
  0x26   : > { %s402_s26 = sshll.u32 %s3061_s14, 4  ;;  %p2842_p1 = scmp.ne.s32.totalorder %s3722_s3, %s2841_s21  ;;  %s403_s26 = int_to_ptr.vmem [resolvable:$true] %s402_s26 }
  0x27   : > { %p3255_p2 = pneg %p3243_p0  ;;  %p2848_p6 = scmp.lt.u32.totalorder %s2841_s21, %s3722_s3 }
  0x29   : > { %p2844_p4 = pnand %p3255_p2, %p2842_p1 }
  0x2b   : > { %p2845_p5 = pneg %p2844_p4 }
  0x2d   : > { %p2850_p7 = pnand %p2848_p6, %p2845_p5 }
  0x2f   : > { %2853 = shalt.err (!%p2850_p7)
}
  0x30   : > { %s2854_s24 = scalar_lea.vmem %s403_s26, 256  ;;  %p2862_p8 = scmp.lt.s32.totalorder %s403_s26, %s403_s26 }
  0x31   : > { %p2855_p9 = scmp.ne.s32.totalorder %s403_s26, %s2854_s24  ;;  %p2863_p3 = scmp.lt.s32.totalorder %s2854_s24, %s2854_s24 }
  0x33   : > { %p2857_p11 = pnand %p2855_p9, %p3255_p2  ;;  %p2864_p12 = por %p2863_p3, %p2862_p8 }
  0x35   : > { %p2858_p13 = pneg %p2857_p11 }
  0x37   : > { %p2865_p10 = pnand %p2864_p12, %p2858_p13 }
  0x39   : > { %2868 = shalt.err (!%p2865_p10)
}
  0x3a   : > { %s3062_s29 = smov 64   ;;  %s3063_s19 = smov 4  }
  0x3b   : > { %2698 = dma.hbm_to_vmem [thread:$0]  (!%p3243_p0), %s3722_s3, 256, %s403_s26, [#allocation8], %s3062_s29, %s3062_s29, %s3063_s19  }
  0x3c   : > { %s3064_s21 = smov [#allocation4]   ;;  %s3065_s15 = smov [#allocation9]  }
  0x3d   : > { %s389_s14 = sshll.u32 %s3064_s21, 4  ;;  %s415_s20 = sshll.u32 %s3065_s15, 4  ;;  %s390_s14 = int_to_ptr.vmem [resolvable:$true] %s389_s14  ;;  %s3274_s20 = int_to_ptr.vmem [resolvable:$true] %s415_s20 }
  0x3e   : > { %s2869_s27 = scalar_lea.hbm %s3721_s2, 256 }
  0x3f   : > { %p2870_p3 = scmp.ne.s32.totalorder %s3721_s2, %s2869_s27  ;;  %p2876_p12 = scmp.lt.u32.totalorder %s2869_s27, %s3721_s2 }
  0x41   : > { %p2872_p8 = pnand %p2870_p3, %p3255_p2 }
  0x43   : > { %p2873_p10 = pneg %p2872_p8 }
  0x45   : > { %p2878_p1 = pnand %p2876_p12, %p2873_p10 }
  0x47   : > { %2881 = shalt.err (!%p2878_p1)
}
  0x48   : > { %s2882_s15 = scalar_lea.vmem %s390_s14, 256  ;;  %p2890_p7 = scmp.lt.s32.totalorder %s390_s14, %s390_s14 }
  0x49   : > { %p2883_p4 = scmp.ne.s32.totalorder %s390_s14, %s2882_s15  ;;  %p2891_p9 = scmp.lt.s32.totalorder %s2882_s15, %s2882_s15 }
  0x4b   : > { %p2885_p5 = pnand %p2883_p4, %p3255_p2  ;;  %p2892_p11 = por %p2891_p9, %p2890_p7 }
  0x4d   : > { %p2886_p6 = pneg %p2885_p5 }
  0x4f   : > { %p2893_p13 = pnand %p2892_p11, %p2886_p6 }
  0x51   : > { %2896 = shalt.err (!%p2893_p13)
}
  0x52   : > { %2695 = dma.hbm_to_vmem [thread:$0]  (!%p3243_p0), %s3721_s2, 256, %s390_s14, [#allocation5], %s3062_s29, %s3062_s29, %s3063_s19  }
  0x53   : > { %s2897_s13 = scalar_lea.hbm %s3723_s4, 256 }
  0x54   : > { %p2898_p3 = scmp.ne.s32.totalorder %s3723_s4, %s2897_s13  ;;  %p2904_p12 = scmp.lt.u32.totalorder %s2897_s13, %s3723_s4 }
  0x56   : > { %p2900_p8 = pnand %p2898_p3, %p3255_p2 }
  0x58   : > { %p2901_p10 = pneg %p2900_p8 }
  0x5a   : > { %p2906_p1 = pnand %p2904_p12, %p2901_p10 }
  0x5c   : > { %2909 = shalt.err (!%p2906_p1)
}
  0x5d   : > { %s2910_s14 = scalar_lea.vmem %s3274_s20, 256  ;;  %p2918_p7 = scmp.lt.s32.totalorder %s3274_s20, %s3274_s20 }
  0x5e   : > { %p2911_p4 = scmp.ne.s32.totalorder %s3274_s20, %s2910_s14  ;;  %p2919_p9 = scmp.lt.s32.totalorder %s2910_s14, %s2910_s14 }
  0x60   : > { %p2913_p5 = pnand %p2911_p4, %p3255_p2  ;;  %p2920_p11 = por %p2919_p9, %p2918_p7 }
  0x62   : > { %p2914_p6 = pneg %p2913_p5 }
  0x64   : > { %p2921_p13 = pnand %p2920_p11, %p2914_p6 }
  0x66   : > { %2924 = shalt.err (!%p2921_p13)
}
  0x67   : > { %2701 = dma.hbm_to_vmem [thread:$0]  (!%p3243_p0), %s3723_s4, 256, %s3274_s20, [#allocation8], %s3062_s29, %s3062_s29, %s3063_s19  }
  0x68   : > { %s3066_s9 = smov [#allocation10]   ;;  %s2925_s21 = scalar_lea.hbm %s3725_s6, 256 }
  0x69   : > { %s431_s12 = sshll.u32 %s3066_s9, 4  ;;  %p2926_p3 = scmp.ne.s32.totalorder %s3725_s6, %s2925_s21  ;;  %s432_s12 = int_to_ptr.vmem [resolvable:$true] %s431_s12 }
  0x6a   : > { %p2932_p12 = scmp.lt.u32.totalorder %s2925_s21, %s3725_s6 }
  0x6b   : > { %p2928_p8 = pnand %p2926_p3, %p3255_p2 }
  0x6d   : > { %p2929_p10 = pneg %p2928_p8 }
  0x6f   : > { %p2934_p1 = pnand %p2932_p12, %p2929_p10 }
  0x71   : > { %2937 = shalt.err (!%p2934_p1)
}
  0x72   : > { %s2938_s20 = scalar_lea.vmem %s432_s12, 256  ;;  %p2946_p7 = scmp.lt.s32.totalorder %s432_s12, %s432_s12 }
  0x73   : > { %p2939_p4 = scmp.ne.s32.totalorder %s432_s12, %s2938_s20  ;;  %p2947_p9 = scmp.lt.s32.totalorder %s2938_s20, %s2938_s20 }
  0x75   : > { %p2941_p5 = pnand %p2939_p4, %p3255_p2  ;;  %p2948_p11 = por %p2947_p9, %p2946_p7 }
  0x77   : > { %p2942_p6 = pneg %p2941_p5 }
  0x79   : > { %p2949_p13 = pnand %p2948_p11, %p2942_p6 }
  0x7b   : > { %2952 = shalt.err (!%p2949_p13)
}
  0x7c   : > { %2704 = dma.hbm_to_vmem [thread:$0]  (!%p3243_p0), %s3725_s6, 256, %s432_s12, [#allocation11], %s3062_s29, %s3062_s29, %s3063_s19  }
  0x7d   : > { %p3771_p3 = scmp.ne.s32.totalorder %s3766_s23, 0 }
  0x7e   : > { %p3772_p2 = scmp.ne.s32.totalorder (!%p3771_p3), %s3767_s18, 0 }
  0x7f   : > { %476 = sbr.rel (%p3771_p3) target bundleno = 3099 (0xc1b), region = 76 }
  0x86   : > { %3014 = dma.done.wait (%p3772_p2), [#allocation5], 256  }
  0x87   : > { %3016 = vsyncadd (%p3772_p2), [#allocation5], 4294967040 }
  0x88   : > { %3018 = dma.done.wait (%p3772_p2), [#allocation8], 512  }
  0x89   : > { %3020 = vsyncadd (%p3772_p2), [#allocation8], 4294966784 }
  0x8a   : > { %3022 = dma.done.wait (%p3772_p2), [#allocation11], 256  }
  0x8b   : > { %3024 = vsyncadd (%p3772_p2), [#allocation11], 4294967040  ;;  %s531_s23 = sand.u32 1, %s3035_s30   ;;  %p534_p0 = scmp.lt.s32.totalorder %s3047_s17, 1 }
  0x8c   : > { %s3362_s28 = sshll.u32 %s531_s23, 3  ;;  %s2483_s25 = sshll.u32 %s3043_s16, 3 }
  0x8d   : > { %s535_s29 = scalar_select %p534_p0, %s3047_s17, 1 }
  0x8e   : > { %s533_s18 = scalar_lea.vmem [#allocation12], %s3362_s28  ;;  %p2484_p8 = scmp.ne.s32.totalorder %s3043_s16, 0 }
  0x8f   : > { %s2537_s19 = sshll.u32 %s535_s29, 4  ;;  %v2805_v0 = vld [vmem:[#allocation4] sm:$0xff] (!%p2484_p8)   ;;  %v3067_v1 = vmov (!%p2484_p8), 0.0   ;;  %v2806_v2 = vld [vmem:[#allocation4 + $0x8] sm:$0xff] (!%p2484_p8)   ;;  %v2807_v3 = vld [vmem:[#allocation7] sm:$0xff] (!%p2484_p8)   ;;  %vm3068_vm0 = vmmov (!%p2484_p8), 0   ;;  %v691_v18 = vlaneseq (!%p2484_p8) }
  0x90   : > { %s3369_s27 = scalar_lea.vmem %s3719_s0, %s2537_s19  ;;  %544 = sbr.rel (%p2484_p8) target bundleno = 533 (0x215), region = 96  ;;  %2574 = vmatprep.subr.bf16.mxu0 (!%p2484_p8), %v3067_v1  ;;  %2582 = vmatprep.subr.bf16.mxu1 (!%p2484_p8), %v3067_v1  ;;  %v2808_v6 = vld [vmem:[#allocation7 + $0x8] sm:$0xff] (!%p2484_p8)   ;;  %vm564_vm1 = vcmask (!%p2484_p8), 261120   ;;  %v3072_v16 = vmov (!%p2484_p8), 1983009808   ;;  %vm962_vm2 = vcmask (!%p2484_p8), 64512  }
  0x91   : > { %2575 = vmatpush3.bf16.msra.mxu0 (!%p2484_p8), %v2805_v0  ;;  %2578 = vmatprep.mubr.msk.bf16.mxu0 (!%p2484_p8), %vm3068_vm0, %v3067_v1  ;;  %v545_v4 = vld [vmem:[%s3369_s27] sm:$0xff] (!%p2484_p8)  ;;  %v546_v5 = vld [vmem:[%s3369_s27 + $0x8] sm:$0xff] (!%p2484_p8)  ;;  %s3069_s13 = smov (!%p2484_p8), 112   ;;  %s3070_s21 = smov (!%p2484_p8), 120   ;;  %v689_v17 = vunpack.c.l.s4 (!%p2484_p8), %v3072_v16  ;;  %v3073_v19 = vmov (!%p2484_p8), 1934713408  }
  0x92   : > { %2576 = vmatprep.subr.bf16.mxu0 (!%p2484_p8), %v3067_v1  ;;  %2586 = vmatprep.mubr.msk.bf16.mxu1 (!%p2484_p8), %vm3068_vm0, %v3067_v1  ;;  %v547_v7 = vpack.c.bf16 (!%p2484_p8), %v546_v5, %v545_v4  ;;  %s3071_s24 = smov (!%p2484_p8), 104   ;;  %v721_v20 = vunpack.c.l.s4 (!%p2484_p8), %v3073_v19  ;;  %v692_v22 = vshrl.u32 (!%p2484_p8), %v691_v18, 7 }
  0x93   : > { %2583 = vmatpush3.bf16.msra.mxu1 (!%p2484_p8), %v2807_v3  ;;  %v690_v21 = vunpack.c.0.s8 (!%p2484_p8), %v689_v17 }
  0x94   : > { %2584 = vmatprep.subr.bf16.mxu1 (!%p2484_p8), %v3067_v1  ;;  %v722_v25 = vunpack.c.0.s8 (!%p2484_p8), %v721_v20 }
  0x95   : > { %2577 = vmatpush3.bf16.msra.mxu0 (!%p2484_p8), %v2806_v2  ;;  %v3390_v26 = vsub.s32 (!%p2484_p8), %v690_v21, %v692_v22 }
  0x96   : > { %v3392_v33 = vsub.s32 (!%p2484_p8), %v722_v25, %v692_v22 }
  0x97   : > { %2585 = vmatpush3.bf16.msra.mxu1 %v2808_v6 }
  0x98   : > { %2579 = vmatmul.mubr.msk.bf16.vlgmr.msra.gmra.mrb[0].mxu0 %vm564_vm1, %v547_v7 }
  0x9a   : > { %2587 = vmatmul.mubr.msk.bf16.vlgmr.msra.gmra.mrb[0].mxu1 %vm564_vm1, %v547_v7 }
 0x16b   : > { %v602_v8 = vpop.f32.mrb[0].mxu0 }
 0x16c   : > { %674 = vrot.lane.b32.xlu1 %v602_v8, %s3069_s13  ;;  %668 = vrot.lane.b32.xlu0 %v602_v8, %s3070_s21  ;;  %v2580_v9 = vpop.f32.mrb[1].mxu0 }
 0x16d   : > { %v3375_v10 = vpop.f32.mrb[2].mxu0  ;;  %v3377_v11 = vpop.f32.mrb[0].mxu1 }
 0x16e   : > { %v2581_v12 = vpop.f32.mrb[3].mxu0  ;;  %v2588_v13 = vpop.f32.mrb[1].mxu1 }
 0x16f   : > { %v3379_v14 = vpop.f32.mrb[2].mxu1 }
 0x170   : > { %680 = vrot.lane.b32.xlu0 %v602_v8, %s3071_s24  ;;  %676 = vrot.lane.b32.xlu1 %v3375_v10, %s3069_s13  ;;  %v2589_v15 = vpop.f32.mrb[3].mxu1 }
 0x174   : > { %969 = vrot.lane.b32.xlu0 %v3377_v11, %s3070_s21  ;;  %682 = vrot.lane.b32.xlu1 %v3375_v10, %s3071_s24 }
 0x178   : > { %975 = vrot.lane.b32.xlu0 %v3377_v11, %s3069_s13  ;;  %971 = vrot.lane.b32.xlu1 %v3379_v14, %s3070_s21 }
 0x17c   : > { %977 = vrot.lane.b32.xlu1 %v3379_v14, %s3069_s13  ;;  %670 = vrot.lane.b32.xlu0 %v3375_v10, %s3070_s21 }
 0x180   : > { %983 = vrot.lane.b32.xlu1 %v3379_v14, %s3071_s24  ;;  %981 = vrot.lane.b32.xlu0 %v3377_v11, %s3071_s24 }
 0x1de   : > { %v675_v23 = vpop.permute.xlu1 %674  ;;  %v669_v24 = vpop.permute.xlu0 %668 }
 0x1df   : > { %v686_v27 = vcombine.low %v602_v8, %v675_v23  ;;  %v687_v28 = vcombine.high %v602_v8, %v675_v23 }
 0x1e1   : > { %v694_v34 = vrot.slane %v686_v27, %v3390_v26  ;;  %v701_v35 = vrot.slane %v687_v28, %v3390_v26 }
 0x1e2   : > { %v681_v29 = vpop.permute.xlu0 %680  ;;  %v677_v30 = vpop.permute.xlu1 %676 }
 0x1e3   : > { %v702_v31 = vcombine.low %v669_v24, %v681_v29  ;;  %v703_v32 = vcombine.high %v669_v24, %v681_v29  ;;  %v754_v54 = vcombine.low %v3375_v10, %v677_v30  ;;  %v755_v55 = vcombine.high %v3375_v10, %v677_v30 }
 0x1e5   : > { %v710_v36 = vrot.slane %v702_v31, %v3390_v26  ;;  %v717_v37 = vrot.slane %v703_v32, %v3390_v26  ;;  %v762_v10 = vrot.slane %v754_v54, %v3390_v26 }
 0x1e6   : > { %v3398_v38 = vpop.permute.xlu0 %969  ;;  %v683_v39 = vpop.permute.xlu1 %682 }
 0x1e7   : > { %v718_v40 = vcombine.low %v694_v34, %v710_v36  ;;  %v719_v41 = vcombine.high %v694_v34, %v710_v36  ;;  %v734_v42 = vcombine.low %v701_v35, %v717_v37  ;;  %v735_v43 = vcombine.high %v701_v35, %v717_v37 }
 0x1e9   : > { %v726_v44 = vrot.slane %v718_v40, %v3392_v33  ;;  %v733_v45 = vrot.slane %v719_v41, %v3392_v33  ;;  %v742_v46 = vrot.slane %v734_v42, %v3392_v33  ;;  %v749_v47 = vrot.slane %v735_v43, %v3392_v33 }
 0x1ea   : > { %v976_v48 = vpop.permute.xlu0 %975  ;;  %v972_v49 = vpop.permute.xlu1 %971 }
 0x1eb   : > { %v822_v50 = vcombine.low %v726_v44, %v733_v45  ;;  %v2491_v51 = vcombine.high %v726_v44, %v733_v45  ;;  %v838_v52 = vcombine.low %v742_v46, %v749_v47  ;;  %v2492_v53 = vcombine.high %v742_v46, %v749_v47 }
 0x1ec   : > { %v987_v60 = vcombine.low %v3377_v11, %v976_v48  ;;  %v988_v61 = vcombine.high %v3377_v11, %v976_v48  ;;  %v769_v11 = vrot.slane %v755_v55, %v3390_v26 }
 0x1ed   : > { %v829_v56 = vrot.slane %v822_v50, %v3390_v26  ;;  %v837_v57 = vrot.slane %v2491_v51, %v3390_v26  ;;  %v845_v58 = vrot.slane %v838_v52, %v3390_v26  ;;  %v853_v59 = vrot.slane %v2492_v53, %v3390_v26 }
 0x1ee   : > { %v978_v62 = vpop.permute.xlu1 %977  ;;  %v671_v63 = vpop.permute.xlu0 %670  ;;  %v3423_v12 = vrot.slane %v987_v60, %v3390_v26  ;;  %v3426_v13 = vrot.slane %v988_v61, %v3390_v26 }
 0x1ef   : > { %v854_v0 = vcombine.low %v829_v56, %v837_v57  ;;  %v855_v1 = vcombine.high %v829_v56, %v837_v57  ;;  %v870_v2 = vcombine.low %v845_v58, %v853_v59  ;;  %v871_v3 = vcombine.high %v845_v58, %v853_v59 }
 0x1f0   : > { %v1055_v4 = vcombine.low %v3379_v14, %v978_v62  ;;  %v1056_v5 = vcombine.high %v3379_v14, %v978_v62  ;;  %v770_v6 = vcombine.low %v671_v63, %v683_v39  ;;  %v771_v7 = vcombine.high %v671_v63, %v683_v39 }
 0x1f1   : > { %v3415_v8 = vrot.slane %v854_v0, %v3392_v33  ;;  %v3418_v9 = vrot.slane %v870_v2, %v3392_v33  ;;  %v3431_v17 = vrot.slane %v855_v1, %v3392_v33  ;;  %v3434_v18 = vrot.slane %v871_v3, %v3392_v33 }
 0x1f2   : > { %v778_v14 = vrot.slane %v770_v6, %v3390_v26  ;;  %v785_v15 = vrot.slane %v771_v7, %v3390_v26  ;;  %v984_v16 = vpop.permute.xlu1 %983  ;;  %v1063_v19 = vrot.slane %v1055_v4, %v3390_v26  ;;  %v1070_v20 = vrot.slane %v1056_v5, %v3390_v26  ;;  %v982_v25 = vpop.permute.xlu0 %981 }
 0x1f3   : > { %v886_v27 = vcombine.low %v3415_v8, %v3418_v9  ;;  %v887_v28 = vcombine.high %v3415_v8, %v3418_v9  ;;  %v1071_v29 = vcombine.low %v972_v49, %v984_v16  ;;  %v1072_v30 = vcombine.high %v972_v49, %v984_v16 }
 0x1f4   : > { %v786_v21 = vcombine.low %v762_v10, %v778_v14  ;;  %v787_v22 = vcombine.high %v762_v10, %v778_v14  ;;  %v802_v23 = vcombine.low %v769_v11, %v785_v15  ;;  %v803_v24 = vcombine.high %v769_v11, %v785_v15 }
 0x1f5   : > { %v1079_v36 = vrot.slane %v1071_v29, %v3390_v26  ;;  %v1086_v37 = vrot.slane %v1072_v30, %v3390_v26  ;;  %v1003_v39 = vcombine.low %v3398_v38, %v982_v25  ;;  %v1004_v40 = vcombine.high %v3398_v38, %v982_v25 }
 0x1f6   : > { %v794_v31 = vrot.slane %v786_v21, %v3392_v33  ;;  %v801_v32 = vrot.slane %v787_v22, %v3392_v33  ;;  %v810_v34 = vrot.slane %v802_v23, %v3392_v33  ;;  %v817_v35 = vrot.slane %v803_v24, %v3392_v33 }
 0x1f7   : > { %v1087_v45 = vcombine.low %v1063_v19, %v1079_v36  ;;  %v1088_v46 = vcombine.high %v1063_v19, %v1079_v36  ;;  %v1103_v47 = vcombine.low %v1070_v20, %v1086_v37  ;;  %v1104_v48 = vcombine.high %v1070_v20, %v1086_v37 }
 0x1f8   : > { %v890_v41 = vcombine.low %v794_v31, %v801_v32  ;;  %v2493_v42 = vcombine.high %v794_v31, %v801_v32  ;;  %v906_v43 = vcombine.low %v810_v34, %v817_v35  ;;  %v2494_v44 = vcombine.high %v810_v34, %v817_v35 }
 0x1f9   : > { %v1095_v53 = vrot.slane %v1087_v45, %v3392_v33  ;;  %v1102_v38 = vrot.slane %v1088_v46, %v3392_v33  ;;  %v1111_v54 = vrot.slane %v1103_v47, %v3392_v33  ;;  %v1118_v55 = vrot.slane %v1104_v48, %v3392_v33 }
 0x1fa   : > { %v897_v49 = vrot.slane %v890_v41, %v3390_v26  ;;  %v905_v50 = vrot.slane %v2493_v42, %v3390_v26  ;;  %v913_v51 = vrot.slane %v906_v43, %v3390_v26  ;;  %v921_v52 = vrot.slane %v2494_v44, %v3390_v26 }
 0x1fb   : > { %v1191_v60 = vcombine.low %v1095_v53, %v1102_v38  ;;  %v2497_v61 = vcombine.high %v1095_v53, %v1102_v38  ;;  %v1207_v62 = vcombine.low %v1111_v54, %v1118_v55  ;;  %v2498_v63 = vcombine.high %v1111_v54, %v1118_v55 }
 0x1fc   : > { %v922_v56 = vcombine.low %v897_v49, %v905_v50  ;;  %v923_v57 = vcombine.high %v897_v49, %v905_v50  ;;  %v938_v58 = vcombine.low %v913_v51, %v921_v52  ;;  %v939_v59 = vcombine.high %v913_v51, %v921_v52 }
 0x1fd   : > { %v888_v4 = vcombine.low %v3431_v17, %v3434_v18  ;;  %v889_v5 = vcombine.high %v3431_v17, %v3434_v18  ;;  %v1011_v6 = vrot.slane %v1003_v39, %v3390_v26  ;;  %v1018_v7 = vrot.slane %v1004_v40, %v3390_v26 }
 0x1fe   : > { %v930_v0 = vrot.slane %v922_v56, %v3392_v33  ;;  %v937_v1 = vrot.slane %v923_v57, %v3392_v33  ;;  %v946_v2 = vrot.slane %v938_v58, %v3392_v33  ;;  %v953_v3 = vrot.slane %v939_v59, %v3392_v33 }
 0x1ff   : > { %v1198_v14 = vrot.slane %v1191_v60, %v3390_v26  ;;  %v1206_v15 = vrot.slane %v2497_v61, %v3390_v26  ;;  %v1214_v16 = vrot.slane %v1207_v62, %v3390_v26  ;;  %v1222_v19 = vrot.slane %v2498_v63, %v3390_v26 }
 0x200   : > { %v954_v8 = vcombine.low %v930_v0, %v946_v2  ;;  %v955_v9 = vcombine.high %v930_v0, %v946_v2  ;;  %v956_v10 = vcombine.low %v937_v1, %v953_v3  ;;  %v957_v11 = vcombine.high %v937_v1, %v953_v3 }
 0x201   : > { %v1019_v18 = vcombine.low %v3423_v12, %v1011_v6  ;;  %v1020_v23 = vcombine.high %v3423_v12, %v1011_v6  ;;  %v1035_v24 = vcombine.low %v3426_v13, %v1018_v7  ;;  %v1036_v25 = vcombine.high %v3426_v13, %v1018_v7 }
 0x202   : > { %v958_v20 = vpack.c.bf16 %v954_v8, %v886_v27  ;;  %v959_v21 = vpack.c.bf16 %v955_v9, %v887_v28  ;;  %v960_v22 = vpack.c.bf16 %v956_v10, %v888_v4  ;;  %v961_v17 = vpack.c.bf16 %v957_v11, %v889_v5 }
 0x203   : > { %v1223_v27 = vcombine.low %v1198_v14, %v1206_v15  ;;  %v1224_v28 = vcombine.high %v1198_v14, %v1206_v15  ;;  %v1239_v29 = vcombine.low %v1214_v16, %v1222_v19  ;;  %v1240_v30 = vcombine.high %v1214_v16, %v1222_v19 }
 0x204   : > { %963 = vst.msk [vmem:[#allocation2] sm:$0xff] %vm962_vm2, %v958_v20  ;;  %964 = vst.msk [vmem:[#allocation2 + $0x8] sm:$0xff] %vm962_vm2, %v959_v21  ;;  %v1027_v31 = vrot.slane %v1019_v18, %v3392_v33  ;;  %v1034_v32 = vrot.slane %v1020_v23, %v3392_v33  ;;  %v1043_v34 = vrot.slane %v1035_v24, %v3392_v33 }
 0x205   : > { %965 = vst.msk [vmem:[#allocation2 + $0x10] sm:$0xff] %vm962_vm2, %v960_v22  ;;  %966 = vst.msk [vmem:[#allocation2 + $0x18] sm:$0xff] %vm962_vm2, %v961_v17  ;;  %v1050_v35 = vrot.slane %v1036_v25, %v3392_v33  ;;  %v1231_v40 = vrot.slane %v1223_v27, %v3392_v33  ;;  %v1238_v13 = vrot.slane %v1224_v28, %v3392_v33 }
 0x206   : > { %v1123_v36 = vcombine.low %v1027_v31, %v1034_v32  ;;  %v2495_v37 = vcombine.high %v1027_v31, %v1034_v32  ;;  %v1247_v41 = vrot.slane %v1239_v29, %v3392_v33  ;;  %v1254_v42 = vrot.slane %v1240_v30, %v3392_v33 }
 0x207   : > { %v1139_v39 = vcombine.low %v1043_v34, %v1050_v35  ;;  %v2496_v12 = vcombine.high %v1043_v34, %v1050_v35 }
 0x208   : > { %v1130_v43 = vrot.slane %v1123_v36, %v3390_v26  ;;  %v1138_v44 = vrot.slane %v2495_v37, %v3390_v26  ;;  %v1255_v51 = vcombine.low %v1231_v40, %v1247_v41  ;;  %v1256_v52 = vcombine.high %v1231_v40, %v1247_v41 }
 0x209   : > { %v1146_v45 = vrot.slane %v1139_v39, %v3390_v26  ;;  %v1154_v46 = vrot.slane %v2496_v12, %v3390_v26  ;;  %v1257_v53 = vcombine.low %v1238_v13, %v1254_v42  ;;  %v1258_v38 = vcombine.high %v1238_v13, %v1254_v42 }
 0x20a   : > { %v1155_v47 = vcombine.low %v1130_v43, %v1138_v44  ;;  %v1156_v48 = vcombine.high %v1130_v43, %v1138_v44 }
 0x20b   : > { %v1171_v49 = vcombine.low %v1146_v45, %v1154_v46  ;;  %v1172_v50 = vcombine.high %v1146_v45, %v1154_v46 }
 0x20c   : > { %v1163_v54 = vrot.slane %v1155_v47, %v3392_v33  ;;  %v1170_v55 = vrot.slane %v1156_v48, %v3392_v33 }
 0x20d   : > { %v1179_v56 = vrot.slane %v1171_v49, %v3392_v33  ;;  %v1186_v57 = vrot.slane %v1172_v50, %v3392_v33 }
 0x20f   : > { %v1187_v58 = vcombine.low %v1163_v54, %v1179_v56  ;;  %v1188_v59 = vcombine.high %v1163_v54, %v1179_v56  ;;  %v1189_v60 = vcombine.low %v1170_v55, %v1186_v57  ;;  %v1190_v26 = vcombine.high %v1170_v55, %v1186_v57 }
 0x211   : > { %v1259_v61 = vpack.c.bf16 %v1255_v51, %v1187_v58  ;;  %v1260_v62 = vpack.c.bf16 %v1256_v52, %v1188_v59  ;;  %v1261_v63 = vpack.c.bf16 %v1257_v53, %v1189_v60  ;;  %v1262_v0 = vpack.c.bf16 %v1258_v38, %v1190_v26 }
 0x213   : > { %1263 = vst.msk [vmem:[#allocation3] sm:$0xff] %vm962_vm2, %v1259_v61  ;;  %1264 = vst.msk [vmem:[#allocation3 + $0x8] sm:$0xff] %vm962_vm2, %v1260_v62 }
 0x214   : > { %1265 = vst.msk [vmem:[#allocation3 + $0x10] sm:$0xff] %vm962_vm2, %v1261_v63  ;;  %1266 = vst.msk [vmem:[#allocation3 + $0x18] sm:$0xff] %vm962_vm2, %v1262_v0 }
 0x215 PF: > { %v2809_v33 = vld [vmem:[%s3720_s1] sm:$0xff]   ;;  %s1267_s14 = scalar_lea.vmem %s3369_s27, %s2483_s25  ;;  %v3074_v1 = vmov 0.0   ;;  %v2810_v2 = vld [vmem:[%s3720_s1 + $0x8] sm:$0xff]   ;;  %vm3075_vm3 = vmmov 0   ;;  %vm1286_vm4 = vcmask 261120   ;;  %s3076_s7 = smov 104   ;;  %v1346_v20 = vlaneseq }
 0x216   : > { %2590 = vmatprep.subr.bf16.mxu0 %v3074_v1  ;;  %2598 = vmatprep.subr.bf16.mxu1 %v3074_v1  ;;  %v3513_v3 = vld [vmem:[%s1267_s14] sm:$0xff]  ;;  %s3077_s25 = smov 120   ;;  %vm1485_vm5 = vcmask 64512   ;;  %v1482_v11 = vld [vmem:[#allocation2 + $0x8] sm:$0xff]  ;;  %s3078_s29 = smov 112   ;;  %v1483_v59 = vld [vmem:[#allocation2 + $0x10] sm:$0xff] }
 0x217   : > { %2591 = vmatpush3.bf16.msra.mxu0 %v2809_v33  ;;  %2594 = vmatprep.mubr.msk.bf16.mxu0 %vm3075_vm3, %v3074_v1  ;;  %v1269_v4 = vpack.c.bf16 %v3513_v3, %v3513_v3  ;;  %v1481_v10 = vld [vmem:[#allocation2] sm:$0xff]  ;;  %v1536_v15 = vsel %vm1485_vm5, %v1482_v11, 0  ;;  %v3079_v16 = vmov 1983009808   ;;  %v3080_v21 = vmov 1934713408  }
 0x218   : > { %2592 = vmatprep.subr.bf16.mxu0 %v3074_v1  ;;  %2600 = vmatprep.mubr.msk.bf16.mxu1 %vm3075_vm3, %v3074_v1  ;;  %v1490_v14 = vsel %vm1485_vm5, %v1481_v10, 0  ;;  %v1344_v19 = vunpack.c.l.s4 %v3079_v16  ;;  %v1376_v22 = vunpack.c.l.s4 %v3080_v21  ;;  %v1347_v18 = vshrl.u32 %v1346_v20, 7  ;;  %v1484_v60 = vld [vmem:[#allocation2 + $0x18] sm:$0xff]  ;;  %s3081_s19 = smov 16   ;;  %s3082_s9 = smov 8  }
 0x219   : > { %2599 = vmatpush3.bf16.xpose.msra.mxu1 %v1490_v14  ;;  %v1582_v62 = vsel %vm1485_vm5, %v1483_v59, 0  ;;  %v1628_v63 = vsel %vm1485_vm5, %v1484_v60, 0  ;;  %vm1670_vm6 = vcmask 130048   ;;  %s3083_s12 = smov 24   ;;  %vm2045_vm7 = vcmask 195584   ;;  %s3773_s13 = sld [smem:[#allocation27_spill]] }
 0x21a   : > { %2610 = vmatprep.subr.bf16.mxu1 %v3074_v1  ;;  %v1345_v17 = vunpack.c.0.s8 %v1344_v19  ;;  %v1377_v25 = vunpack.c.0.s8 %v1376_v22  ;;  %vm2261_vm8 = vcmask 523264   ;;  %s3774_s22 = sld [smem:[#allocation28_spill]]  ;;  %s2533_s26 = sshll.u32 %s3047_s17, 1 }
 0x21b   : > { %2593 = vmatpush3.bf16.msra.mxu0 %v2810_v2  ;;  %s3775_s14 = sld [smem:[#allocation23_spill]]  ;;  %s2348_s20 = sadd.s32 %s3043_s16, %s2533_s26 }
 0x21c   : > { %2604 = vmatprep.subr.bf16.mxu0 %v3074_v1  ;;  %v3528_v27 = vsub.s32 %v1345_v17, %v1347_v18  ;;  %v3530_v34 = vsub.s32 %v1377_v25, %v1347_v18  ;;  %s2352_s27 = sshll.u32 %s533_s18, 4  ;;  %s3778_s17 = sld [smem:[#allocation31_spill]]  ;;  %s3663_s27 = int_to_ptr.vmem [resolvable:$true] %s2352_s27 }
 0x21d   : > { %s2337_s16 = scalar_lea.sflag [#allocation6], %s531_s23  ;;  %s2953_s26 = scalar_lea.vmem %s3663_s27, 128 }
 0x21e   : > { %2595 = vmatmul.mubr.msk.bf16.vlgmr.msra.gmra.mrb[0].mxu0 %vm1286_vm4, %v1269_v4  ;;  %p2954_p10 = scmp.ne.s32.totalorder %s3663_s27, %s2953_s26 }
 0x21f   : > { %2606 = vmatprep.mubr.msk.bf16.mxu0 %vm3075_vm3, %v3074_v1 }
 0x221   : > { %p3780_p12 = scmp.ne.s32.totalorder %s3775_s14, 0 }
 0x222   : > { %s3779_s24 = smov %s3778_s17 }
 0x223   : > { %p2955_p1 = pnand %p2954_p10, %p3780_p12 }
 0x224   : > { %2605 = vmatpush3.bf16.xpose.msra.mxu0 %v1536_v15 }
 0x225   : > { %2616 = vmatprep.subr.bf16.mxu0 %v3074_v1  ;;  %p2956_p4 = pneg %p2955_p1 }
 0x2f1   : > { %v1324_v5 = vpop.f32.mrb[0].mxu0 }
 0x2f2   : > { %v1330_v6 = vmul.f32 0.35355338, %v1324_v5  ;;  %v2596_v7 = vpop.f32.mrb[1].mxu0 }
 0x2f3   : > { %v1327_v8 = vpop.f32.mrb[2].mxu0 }
 0x2f4   : > { %1338 = vrot.lane.b32.xlu1 %v1330_v6, %s3076_s7  ;;  %1332 = vrot.lane.b32.xlu0 %v1330_v6, %s3077_s25  ;;  %v2597_v9 = vpop.f32.mrb[3].mxu0  ;;  %s3776_s25 = sld [smem:[#allocation29_spill]] }
 0x2f8   : > { %1335 = vrot.lane.b32.xlu0 %v1330_v6, %s3078_s29 }
 0x366   : > { %v1339_v23 = vpop.permute.xlu1 %1338  ;;  %v1333_v24 = vpop.permute.xlu0 %1332 }
 0x367   : > { %v1357_v28 = vcombine.low %v1333_v24, %v1339_v23  ;;  %v1358_v29 = vcombine.high %v1333_v24, %v1339_v23 }
 0x369   : > { %v1365_v35 = vrot.slane %v1357_v28, %v3528_v27  ;;  %v1372_v36 = vrot.slane %v1358_v29, %v3528_v27 }
 0x36a   : > { %v1336_v30 = vpop.permute.xlu0 %1335 }
 0x36b   : > { %v1341_v31 = vcombine.low %v1330_v6, %v1336_v30  ;;  %v1342_v32 = vcombine.high %v1330_v6, %v1336_v30 }
 0x36d   : > { %v1349_v37 = vrot.slane %v1341_v31, %v3528_v27  ;;  %v1356_v39 = vrot.slane %v1342_v32, %v3528_v27 }
 0x36f   : > { %v1373_v12 = vcombine.low %v1349_v37, %v1365_v35  ;;  %v1374_v40 = vcombine.high %v1349_v37, %v1365_v35  ;;  %v1389_v13 = vcombine.low %v1356_v39, %v1372_v36  ;;  %v1390_v41 = vcombine.high %v1356_v39, %v1372_v36 }
 0x371   : > { %v1381_v42 = vrot.slane %v1373_v12, %v3530_v34  ;;  %v1388_v43 = vrot.slane %v1374_v40, %v3530_v34  ;;  %v1397_v44 = vrot.slane %v1389_v13, %v3530_v34  ;;  %v1404_v45 = vrot.slane %v1390_v41, %v3530_v34 }
 0x373   : > { %v1409_v46 = vcombine.low %v1381_v42, %v1388_v43  ;;  %v2502_v47 = vcombine.high %v1381_v42, %v1388_v43  ;;  %v1425_v48 = vcombine.low %v1397_v44, %v1404_v45  ;;  %v2503_v49 = vcombine.high %v1397_v44, %v1404_v45 }
 0x375   : > { %v1416_v50 = vrot.slane %v1409_v46, %v3528_v27  ;;  %v1424_v51 = vrot.slane %v2502_v47, %v3528_v27  ;;  %v1432_v52 = vrot.slane %v1425_v48, %v3528_v27  ;;  %v1440_v53 = vrot.slane %v2503_v49, %v3528_v27 }
 0x377   : > { %v1441_v38 = vcombine.low %v1416_v50, %v1424_v51  ;;  %v1457_v54 = vcombine.low %v1432_v52, %v1440_v53  ;;  %v1442_v55 = vcombine.high %v1416_v50, %v1424_v51  ;;  %v1458_v56 = vcombine.high %v1432_v52, %v1440_v53 }
 0x379   : > { %v1449_v57 = vrot.slane %v1441_v38, %v3530_v34  ;;  %v1465_v58 = vrot.slane %v1457_v54, %v3530_v34  ;;  %v1456_v2 = vrot.slane %v1442_v55, %v3530_v34  ;;  %v1472_v4 = vrot.slane %v1458_v56, %v3530_v34  ;;  %v1719_v38 = vld [vmem:[#allocation3] sm:$0xff]  ;;  %v1720_v54 = vld [vmem:[#allocation3 + $0x8] sm:$0xff] }
 0x37b   : > { %v1473_v26 = vcombine.low %v1449_v57, %v1465_v58  ;;  %v1474_v61 = vcombine.high %v1449_v57, %v1465_v58  ;;  %v1475_v5 = vcombine.low %v1456_v2, %v1472_v4  ;;  %v1476_v6 = vcombine.high %v1456_v2, %v1472_v4 }
 0x37d   : > { %v1477_v0 = vpack.c.bf16 %v1473_v26, %v1473_v26  ;;  %v1478_v33 = vpack.c.bf16 %v1474_v61, %v1474_v61  ;;  %v1479_v7 = vpack.c.bf16 %v1475_v5, %v1475_v5  ;;  %v1480_v8 = vpack.c.bf16 %v1476_v6, %v1476_v6 }
 0x37f   : > { %2601 = vmatmul.mubr.msk.bf16.vlgmr.msra.gmra.mrb[0].mxu1 %vm1485_vm5, %v1477_v0  ;;  %2607 = vmatmul.mubr.msk.bf16.vlgmr.msra.gmra.mrb[4].mxu0 %vm1485_vm5, %v1478_v33  ;;  %v1722_v33 = vld [vmem:[#allocation3 + $0x18] sm:$0xff] }
 0x380   : > { %2611 = vmatpush3.bf16.xpose.msra.mxu1 %v1582_v62  ;;  %2617 = vmatpush3.bf16.xpose.msra.mxu0 %v1628_v63  ;;  %v1721_v63 = vld [vmem:[#allocation3 + $0x10] sm:$0xff] }
 0x381   : > { %2612 = vmatprep.mubr.msk.bf16.mxu1 %vm3075_vm3, %v3074_v1  ;;  %2618 = vmatprep.mubr.msk.bf16.mxu0 %vm3075_vm3, %v3074_v1 }
 0x382   : > { %2622 = vmatprep.subr.bf16.mxu1 %v3074_v1  ;;  %2628 = vmatprep.subr.bf16.mxu0 %v3074_v1 }
 0x387   : > { %2613 = vmatmul.mubr.msk.bf16.vlgmr.msra.gmra.mrb[4].mxu1 %vm1485_vm5, %v1479_v7  ;;  %2619 = vmatmul.mubr.msk.bf16.vlgmr.msra.gmra.mrb[8].mxu0 %vm1485_vm5, %v1480_v8 }
 0x388   : > { %2624 = vmatprep.mubr.msk.bf16.mxu1 %vm3075_vm3, %v3074_v1  ;;  %2630 = vmatprep.mubr.msk.bf16.mxu0 %vm3075_vm3, %v3074_v1 }
 0x389   : > { %2623 = vmatpush3.bf16.msra.mxu1 %v1719_v38  ;;  %2629 = vmatpush3.bf16.msra.mxu0 %v1720_v54 }
 0x38a   : > { %2634 = vmatprep.subr.bf16.mxu1 %v3074_v1  ;;  %2640 = vmatprep.subr.bf16.mxu0 %v3074_v1 }
 0x452   : > { %v1526_v9 = vpop.f32.mrb[0].mxu1  ;;  %v1572_v10 = vpop.f32.mrb[4].mxu0 }
 0x453   : > { %v2602_v11 = vpop.f32.mrb[1].mxu1  ;;  %v2608_v14 = vpop.f32.mrb[5].mxu0  ;;  %v1671_v15 = vsel %vm1670_vm6, %v1526_v9, -inf  ;;  %v1674_v16 = vsel %vm1670_vm6, %v1572_v10, -inf }
 0x454   : > { %1672 = vmax.xlane.f32.xlu1 %v1671_v15  ;;  %v1529_v19 = vpop.f32.mrb[2].mxu1  ;;  %1675 = vmax.xlane.f32.xlu0 %v1674_v16  ;;  %v1575_v20 = vpop.f32.mrb[6].mxu0 }
 0x455   : > { %v2603_v21 = vpop.f32.mrb[3].mxu1  ;;  %v2609_v22 = vpop.f32.mrb[7].mxu0 }
 0x45a   : > { %v1618_v17 = vpop.f32.mrb[4].mxu1  ;;  %v1664_v18 = vpop.f32.mrb[8].mxu0 }
 0x45b   : > { %v2614_v23 = vpop.f32.mrb[5].mxu1  ;;  %v2620_v24 = vpop.f32.mrb[9].mxu0  ;;  %v1677_v25 = vsel %vm1670_vm6, %v1618_v17, -inf  ;;  %v1680_v28 = vsel %vm1670_vm6, %v1664_v18, -inf }
 0x45c   : > { %v1621_v29 = vpop.f32.mrb[6].mxu1  ;;  %1678 = vmax.xlane.f32.xlu0 %v1677_v25  ;;  %1681 = vmax.xlane.f32.xlu1 %v1680_v28  ;;  %v1667_v30 = vpop.f32.mrb[10].mxu0 }
 0x45d   : > { %v2615_v31 = vpop.f32.mrb[7].mxu1  ;;  %v2621_v32 = vpop.f32.mrb[11].mxu0 }
 0x4e1   : > { %v1673_v35 = vpop.xlane.xlu1 %1672  ;;  %v1676_v36 = vpop.xlane.xlu0 %1675 }
 0x4e2   : > { %v1683_v37 = vsub.f32 %v1526_v9, %v1673_v35  ;;  %v1684_v39 = vsub.f32 %v1572_v10, %v1676_v36  ;;  %v2811_v9 = vld [vmem:[#allocation9] sm:$0xff]  }
 0x4e4   : > { %v1687_v12 = vmul.f32 1.442695, %v1683_v37  ;;  %v1689_v40 = vmul.f32 1.442695, %v1684_v39 }
 0x4e6   : > { %2819 = vpow2.f32 %v1687_v12 }
 0x4e7   : > { %2821 = vpow2.f32 %v1689_v40 }
 0x4e9   : > { %v1679_v13 = vpop.xlane.xlu0 %1678  ;;  %v1682_v41 = vpop.xlane.xlu1 %1681 }
 0x4ea   : > { %v1685_v42 = vsub.f32 %v1618_v17, %v1679_v13  ;;  %v1686_v43 = vsub.f32 %v1664_v18, %v1682_v41 }
 0x4ec   : > { %v1691_v44 = vmul.f32 1.442695, %v1685_v42  ;;  %v1693_v45 = vmul.f32 1.442695, %v1686_v43  ;;  %v2812_v43 = vld [vmem:[#allocation9 + $0x8] sm:$0xff]  }
 0x4ee   : > { %2823 = vpow2.f32 %v1691_v44 }
 0x4ef   : > { %2825 = vpow2.f32 %v1693_v45 }
 0x4f0   : > { %v2820_v46 = vpop.eup %2819 }
 0x4f1   : > { %v2822_v47 = vpop.eup %2821  ;;  %v1695_v48 = vsel %vm1670_vm6, %v2820_v46, 0.0 }
 0x4f2   : > { %1696 = vadd.xlane.f32.xlu0 %v1695_v48  ;;  %v1698_v49 = vsel %vm1670_vm6, %v2822_v47, 0.0 }
 0x4f3   : > { %1699 = vadd.xlane.f32.xlu1 %v1698_v49 }
 0x4f8   : > { %v2824_v50 = vpop.eup %2823 }
 0x4f9   : > { %v2826_v51 = vpop.eup %2825  ;;  %v1701_v52 = vsel %vm1670_vm6, %v2824_v50, 0.0 }
 0x4fa   : > { %1702 = vadd.xlane.f32.xlu0 %v1701_v52  ;;  %v1704_v53 = vsel %vm1670_vm6, %v2826_v51, 0.0 }
 0x4fb   : > { %1705 = vadd.xlane.f32.xlu1 %v1704_v53 }
 0x57f   : > { %v1697_v55 = vpop.xlane.xlu0 %1696 }
 0x580   : > { %2827 = vrcp.f32 %v1697_v55  ;;  %v1700_v56 = vpop.xlane.xlu1 %1699 }
 0x581   : > { %2829 = vrcp.f32 %v1700_v56 }
 0x587   : > { %v1703_v57 = vpop.xlane.xlu0 %1702 }
 0x588   : > { %2831 = vrcp.f32 %v1703_v57  ;;  %v1706_v58 = vpop.xlane.xlu1 %1705 }
 0x589   : > { %2833 = vrcp.f32 %v1706_v58 }
 0x58a   : > { %v2828_v59 = vpop.eup %2827 }
 0x58b   : > { %v2830_v60 = vpop.eup %2829  ;;  %v1711_v26 = vmul.f32 %v2828_v59, %v2820_v46 }
 0x58c   : > { %v1712_v61 = vmul.f32 %v2830_v60, %v2822_v47 }
 0x58d   : > { %v1715_v62 = vpack.c.bf16 %v1711_v26, %v1711_v26 }
 0x58e   : > { %v1716_v0 = vpack.c.bf16 %v1712_v61, %v1712_v61 }
 0x58f   : > { %2625 = vmatmul.mubr.msk.bf16.vlgmr.msra.gmra.mrb[8].mxu1 %vm1670_vm6, %v1715_v62 }
 0x590   : > { %2631 = vmatmul.mubr.msk.bf16.vlgmr.msra.gmra.mrb[12].mxu0 %vm1670_vm6, %v1716_v0  ;;  %2635 = vmatpush3.bf16.msra.mxu1 %v1721_v63 }
 0x591   : > { %2641 = vmatpush3.bf16.msra.mxu0 %v1722_v33  ;;  %2636 = vmatprep.mubr.msk.bf16.mxu1 %vm3075_vm3, %v3074_v1 }
 0x592   : > { %v2832_v2 = vpop.eup %2831  ;;  %2642 = vmatprep.mubr.msk.bf16.mxu0 %vm3075_vm3, %v3074_v1  ;;  %2646 = vmatprep.subr.bf16.mxu1 %v3074_v1 }
 0x593   : > { %v2834_v4 = vpop.eup %2833  ;;  %v1713_v5 = vmul.f32 %v2832_v2, %v2824_v50  ;;  %2654 = vmatprep.subr.bf16.mxu0 %v3074_v1 }
 0x594   : > { %v1714_v6 = vmul.f32 %v2834_v4, %v2826_v51 }
 0x595   : > { %v1717_v7 = vpack.c.bf16 %v1713_v5, %v1713_v5 }
 0x596   : > { %v1718_v8 = vpack.c.bf16 %v1714_v6, %v1714_v6 }
 0x597   : > { %2637 = vmatmul.mubr.msk.bf16.vlgmr.msra.gmra.mrb[12].mxu1 %vm1670_vm6, %v1717_v7 }
 0x598   : > { %2643 = vmatmul.mubr.msk.bf16.vlgmr.msra.gmra.mrb[16].mxu0 %vm1670_vm6, %v1718_v8  ;;  %2650 = vmatprep.mubr.msk.bf16.mxu1 %vm3075_vm3, %v3074_v1  ;;  %v2514_v8 = vld [vmem:[%s3724_s5] ss:$0 sm:$0xff] }
 0x599   : > { %2658 = vmatprep.mubr.msk.bf16.mxu0 %vm3075_vm3, %v3074_v1  ;;  %2647 = vmatpush3.bf16.msra.mxu1 %v2811_v9 }
 0x59a   : > { %2648 = vmatprep.subr.bf16.mxu1 %v3074_v1 }
 0x59d   : > { %2649 = vmatpush3.bf16.msra.mxu1 %v2812_v43 }
 0x59e   : > { %2662 = vmatprep.subr.bf16.mxu1 %v3074_v1 }
 0x662   : > { %v1760_v10 = vpop.f32.mrb[8].mxu1 }
 0x663   : > { %v1803_v11 = vpop.f32.mrb[12].mxu0  ;;  %v2626_v14 = vpop.f32.mrb[9].mxu1 }
 0x664   : > { %v2632_v15 = vpop.f32.mrb[13].mxu0  ;;  %v1763_v16 = vpop.f32.mrb[10].mxu1 }
 0x665   : > { %v1806_v19 = vpop.f32.mrb[14].mxu0  ;;  %v2627_v20 = vpop.f32.mrb[11].mxu1 }
 0x666   : > { %v2633_v21 = vpop.f32.mrb[15].mxu0 }
 0x66a   : > { %v1846_v22 = vpop.f32.mrb[12].mxu1 }
 0x66b   : > { %v1895_v17 = vcombine.low %v1760_v10, %v1846_v22  ;;  %v1896_v18 = vcombine.high %v1760_v10, %v1846_v22  ;;  %v1889_v23 = vpop.f32.mrb[16].mxu0  ;;  %v2638_v24 = vpop.f32.mrb[13].mxu1 }
 0x66c   : > { %v1911_v25 = vcombine.low %v1803_v11, %v1889_v23  ;;  %v1912_v28 = vcombine.high %v1803_v11, %v1889_v23  ;;  %v2644_v29 = vpop.f32.mrb[17].mxu0  ;;  %v1849_v30 = vpop.f32.mrb[14].mxu1  ;;  %v2813_v23 = vld [vmem:[#allocation10] sm:$0xff]   ;;  %v2814_v24 = vld [vmem:[#allocation10 + $0x8] sm:$0xff]  }
 0x66d   : > { %v1903_v31 = vrot.slane %v1895_v17, %v3528_v27  ;;  %v1910_v32 = vrot.slane %v1896_v18, %v3528_v27  ;;  %v1892_v35 = vpop.f32.mrb[18].mxu0  ;;  %v2639_v36 = vpop.f32.mrb[15].mxu1  ;;  %2655 = vmatpush3.bf16.msra.mxu0 %v2813_v23  ;;  %v2518_v30 = vld [vmem:[%s3729_s10] ss:$0 sm:$0xff] }
 0x66e   : > { %v1919_v37 = vrot.slane %v1911_v25, %v3528_v27  ;;  %v1926_v39 = vrot.slane %v1912_v28, %v3528_v27  ;;  %v2645_v12 = vpop.f32.mrb[19].mxu0  ;;  %2656 = vmatprep.subr.bf16.mxu0 %v3074_v1 }
 0x66f   : > { %v2816_v12 = vld [vmem:[%s3727_s8 + $0x8] sm:$0xff]  }
 0x670   : > { %v1927_v40 = vcombine.low %v1903_v31, %v1919_v37  ;;  %v1928_v13 = vcombine.high %v1903_v31, %v1919_v37  ;;  %v1943_v41 = vcombine.low %v1910_v32, %v1926_v39  ;;  %v1944_v42 = vcombine.high %v1910_v32, %v1926_v39  ;;  %v2519_v32 = vld [vmem:[%s3730_s11] ss:$0 sm:$0xff] }
 0x671   : > { %2657 = vmatpush3.bf16.msra.mxu0 %v2814_v24  ;;  %v2815_v39 = vld [vmem:[%s3727_s8] sm:$0xff]  }
 0x672   : > { %v1935_v44 = vrot.slane %v1927_v40, %v3530_v34  ;;  %v1942_v45 = vrot.slane %v1928_v13, %v3530_v34  ;;  %v1951_v46 = vrot.slane %v1943_v41, %v3530_v34  ;;  %v1958_v47 = vrot.slane %v1944_v42, %v3530_v34  ;;  %v2817_v40 = vld [vmem:[%s3727_s8 + $0x10] sm:$0xff]   ;;  %v2818_v13 = vld [vmem:[%s3727_s8 + $0x18] sm:$0xff]   ;;  %v2520_v41 = vld [vmem:[%s3773_s13] ss:$0 sm:$0xff] }
 0x674   : > { %v1963_v48 = vcombine.low %v1935_v44, %v1942_v45  ;;  %v2512_v49 = vcombine.high %v1935_v44, %v1942_v45  ;;  %v1979_v50 = vcombine.low %v1951_v46, %v1958_v47  ;;  %v2513_v51 = vcombine.high %v1951_v46, %v1958_v47 }
 0x676   : > { %v1970_v52 = vrot.slane %v1963_v48, %v3528_v27  ;;  %v1978_v53 = vrot.slane %v2512_v49, %v3528_v27  ;;  %v1986_v38 = vrot.slane %v1979_v50, %v3528_v27  ;;  %v1994_v54 = vrot.slane %v2513_v51, %v3528_v27 }
 0x678   : > { %v1996_v55 = vcombine.high %v1970_v52, %v1978_v53  ;;  %v2012_v56 = vcombine.high %v1986_v38, %v1994_v54  ;;  %v1995_v57 = vcombine.low %v1970_v52, %v1978_v53  ;;  %v2011_v58 = vcombine.low %v1986_v38, %v1994_v54 }
 0x67a   : > { %v2010_v59 = vrot.slane %v1996_v55, %v3530_v34  ;;  %v2026_v60 = vrot.slane %v2012_v56, %v3530_v34  ;;  %v2003_v26 = vrot.slane %v1995_v57, %v3530_v34  ;;  %v2019_v61 = vrot.slane %v2011_v58, %v3530_v34  ;;  %v2524_v55 = vld [vmem:[%s3774_s22] ss:$0 sm:$0xff] }
 0x67c   : > { %v2029_v62 = vcombine.low %v2010_v59, %v2026_v60  ;;  %v2028_v63 = vcombine.high %v2003_v26, %v2019_v61  ;;  %v2030_v0 = vcombine.high %v2010_v59, %v2026_v60  ;;  %v2027_v33 = vcombine.low %v2003_v26, %v2019_v61 }
 0x67e   : > { %2036 = vrot.lane.b32.xlu1 %v2029_v62, %s3081_s19  ;;  %2032 = vrot.lane.b32.xlu0 %v2028_v63, %s3082_s9  ;;  %s3777_s9 = sld [smem:[#allocation30_spill]] }
 0x682   : > { %2040 = vrot.lane.b32.xlu1 %v2030_v0, %s3083_s12  ;;  %s2534_s12 = sshll.u32 %s2348_s20, 7  ;;  %s3084_s20 = smov [#allocation12]  }
 0x683   : > { %s3661_s22 = scalar_lea.hbm %s3778_s17, %s2534_s12  ;;  %s2957_s15 = sshll.u32 %s3084_s20, 4  ;;  %s2958_s15 = int_to_ptr.vmem [resolvable:$false] %s2957_s15 }
 0x684   : > { %s2959_s7 = scalar_lea.vmem %s2958_s15, 256  ;;  %p2960_p5 = scmp.lt.s32.totalorder %s3663_s27, %s2958_s15 }
 0x685   : > { %p2961_p6 = scmp.lt.s32.totalorder %s2959_s7, %s2953_s26 }
 0x687   : > { %p2962_p7 = por %p2961_p6, %p2960_p5 }
 0x689   : > { %p2963_p9 = pnand %p2962_p7, %p2956_p4 }
 0x6f0   : > { %v2037_v27 = vpop.permute.xlu1 %2036  ;;  %v2033_v2 = vpop.permute.xlu0 %2032 }
 0x6f1   : > { %v2043_v4 = vsel %vm1485_vm5, %v2027_v33, %v2033_v2 }
 0x6f2   : > { %v2044_v6 = vsel %vm1670_vm6, %v2043_v4, %v2037_v27 }
 0x6f4   : > { %v2041_v5 = vpop.permute.xlu1 %2040 }
 0x6f5   : > { %v2046_v7 = vsel %vm2045_vm7, %v2044_v6, %v2041_v5 }
 0x6f6   : > { %v2047_v34 = vpack.c.bf16 %v2046_v7, %v2046_v7  ;;  %v2530_v7 = vld [vmem:[%s3776_s25] ss:$0 sm:$0xff] }
 0x6f8   : > { %2651 = vmatmul.mubr.msk.bf16.vlgmr.msra.gmra.mrb[16].mxu1 %vm1286_vm4, %v2047_v34 }
 0x6f9   : > { %2670 = vmatprep.mubr.msk.bf16.mxu1 %vm3075_vm3, %v3074_v1  ;;  %2663 = vmatpush3.bf16.msra.mxu1 %v2815_v39 }
 0x6fa   : > { %2664 = vmatprep.subr.bf16.mxu1 %v3074_v1 }
 0x6fd   : > { %2665 = vmatpush3.bf16.msra.mxu1 %v2816_v12 }
 0x6fe   : > { %2666 = vmatprep.subr.bf16.mxu1 %v3074_v1 }
 0x701   : > { %2667 = vmatpush3.bf16.msra.mxu1 %v2817_v40 }
 0x702   : > { %2668 = vmatprep.subr.bf16.mxu1 %v3074_v1 }
 0x705   : > { %2669 = vmatpush3.bf16.msra.mxu1 %v2818_v13 }
 0x7cb   : > { %v2108_v9 = vpop.f32.mrb[16].mxu1 }
 0x7cc   : > { %v2109_v10 = vadd.f32 %v2514_v8, %v2108_v9  ;;  %v2652_v11 = vpop.f32.mrb[17].mxu1  ;;  %v2531_v8 = vld [vmem:[%s3777_s9] ss:$0 sm:$0xff] }
 0x7cd   : > { %v2111_v14 = vpop.f32.mrb[18].mxu1 }
 0x7ce   : > { %v2653_v15 = vpop.f32.mrb[19].mxu1  ;;  %v2114_v16 = vadd.f32 %v2109_v10, %v3513_v3 }
 0x7d0   : > { %v2117_v19 = vsel %vm1286_vm4, %v2114_v16, 0.0 }
 0x7d1   : > { %2118 = vadd.xlane.f32.xlu0 %v2117_v19 }
 0x85e   : > { %v2119_v20 = vpop.xlane.xlu0 %2118 }
 0x85f   : > { %v2121_v21 = vmul.f32 0.03125, %v2119_v20 }
 0x861   : > { %v2122_v22 = vsub.f32 %v2114_v16, %v2121_v21 }
 0x863   : > { %v2123_v17 = vmul.f32 %v2122_v22, %v2122_v22 }
 0x865   : > { %v2124_v18 = vsel %vm1286_vm4, %v2123_v17, 0.0 }
 0x866   : > { %2125 = vadd.xlane.f32.xlu1 %v2124_v18 }
 0x8f3   : > { %v2126_v25 = vpop.xlane.xlu1 %2125 }
 0x8f4   : > { %v2127_v28 = vmul.f32 0.03125, %v2126_v25 }
 0x8f6   : > { %v2128_v29 = vadd.f32 1e-05, %v2127_v28 }
 0x8f8   : > { %2835 = vrsqrt.f32 %v2128_v29 }
 0x902   : > { %v2836_v3 = vpop.eup %2835 }
 0x903   : > { %v2130_v31 = vmul.f32 %v2836_v3, %v2122_v22 }
 0x905   : > { %v2137_v35 = vmul.f32 %v2518_v30, %v2130_v31 }
 0x907   : > { %v2144_v36 = vadd.f32 %v2519_v32, %v2137_v35 }
 0x909   : > { %v2145_v37 = vpack.c.bf16 %v2144_v36, %v2144_v36 }
 0x90b   : > { %2659 = vmatmul.mubr.msk.bf16.vlgmr.msra.gmra.mrb[20].mxu0 %vm1286_vm4, %v2145_v37 }
 0x9de   : > { %v2206_v42 = vpop.f32.mrb[20].mxu0 }
 0x9df   : > { %v2207_v43 = vadd.f32 %v2520_v41, %v2206_v42  ;;  %v2660_v44 = vpop.f32.mrb[21].mxu0 }
 0x9e0   : > { %v2209_v45 = vpop.f32.mrb[22].mxu0 }
 0x9e1   : > { %v2213_v46 = vmul.f32 0.044715, %v2207_v43  ;;  %v2661_v47 = vpop.f32.mrb[23].mxu0  ;;  %v2212_v53 = vmul.f32 0.5, %v2207_v43 }
 0x9e3   : > { %v2214_v48 = vmul.f32 %v2213_v46, %v2207_v43 }
 0x9e5   : > { %v2215_v49 = vmul.f32 %v2214_v48, %v2207_v43 }
 0x9e7   : > { %v2216_v50 = vadd.f32 %v2215_v49, %v2207_v43 }
 0x9e9   : > { %v2217_v51 = vmul.f32 0.7978846, %v2216_v50 }
 0x9eb   : > { %2837 = vtanh.f32 %v2217_v51 }
 0x9f5   : > { %v2838_v52 = vpop.eup %2837 }
 0x9f6   : > { %v2219_v38 = vadd.f32 1.0, %v2838_v52 }
 0x9f8   : > { %v2220_v1 = vmul.f32 %v2219_v38, %v2212_v53 }
 0x9fa   : > { %v2221_v54 = vpack.c.bf16 %v2220_v1, %v2220_v1 }
 0x9fc   : > { %2671 = vmatmul.mubr.msk.bf16.vlgmr.msra.gmra.mrb[20].mxu1 %vm2261_vm8, %v2221_v54 }
 0xacf   : > { %v2299_v56 = vpop.f32.mrb[20].mxu1 }
 0xad0   : > { %v2300_v57 = vadd.f32 %v2524_v55, %v2299_v56  ;;  %v2672_v58 = vpop.f32.mrb[21].mxu1 }
 0xad1   : > { %v2302_v59 = vpop.f32.mrb[22].mxu1 }
 0xad2   : > { %v2673_v60 = vpop.f32.mrb[23].mxu1  ;;  %v2305_v26 = vadd.f32 %v2300_v57, %v2144_v36 }
 0xad4   : > { %v2308_v61 = vsel %vm1286_vm4, %v2305_v26, 0.0 }
 0xad5   : > { %2309 = vadd.xlane.f32.xlu0 %v2308_v61 }
 0xb62   : > { %v2310_v62 = vpop.xlane.xlu0 %2309 }
 0xb63   : > { %v2311_v63 = vmul.f32 0.03125, %v2310_v62 }
 0xb65   : > { %v2312_v0 = vsub.f32 %v2305_v26, %v2311_v63 }
 0xb67   : > { %v2313_v33 = vmul.f32 %v2312_v0, %v2312_v0 }
 0xb69   : > { %v2314_v27 = vsel %vm1286_vm4, %v2313_v33, 0.0 }
 0xb6a   : > { %2315 = vadd.xlane.f32.xlu0 %v2314_v27 }
 0xbf7   : > { %v2316_v2 = vpop.xlane.xlu0 %2315 }
 0xbf8   : > { %v2317_v4 = vmul.f32 0.03125, %v2316_v2 }
 0xbfa   : > { %v2318_v5 = vadd.f32 1e-05, %v2317_v4 }
 0xbfc   : > { %2839 = vrsqrt.f32 %v2318_v5 }
 0xc06   : > { %v2840_v6 = vpop.eup %2839 }
 0xc07   : > { %v2320_v34 = vmul.f32 %v2840_v6, %v2312_v0 }
 0xc09   : > { %v2327_v9 = vmul.f32 %v2530_v7, %v2320_v34 }
 0xc0b   : > { %v2334_v10 = vadd.f32 %v2531_v8, %v2327_v9 }
 0xc0d   : > { %2335 = vst.msk [vmem:[%s533_s18] sm:$0xff] %vm1286_vm4, %v2334_v10 }
 0xc0e   : > { %2966 = shalt.err (!%p2963_p9)
}
 0xc0f   : > { %s2967_s23 = scalar_lea.hbm %s3661_s22, 128  ;;  %s2971_s25 = scalar_lea.hbm %s3779_s24, 512 }
 0xc10   : > { %p2968_p11 = scmp.ne.s32.totalorder %s3661_s22, %s2967_s23  ;;  %p2972_p2 = scmp.lt.u32.totalorder %s3661_s22, %s3779_s24 }
 0xc11   : > { %p2973_p0 = scmp.lt.u32.totalorder %s2971_s25, %s2967_s23  ;;  %p2975_p10 = scmp.lt.u32.totalorder %s2967_s23, %s3661_s22 }
 0xc12   : > { %p2969_p13 = pnand %p2968_p11, %p3780_p12 }
 0xc13   : > { %p2974_p8 = por %p2973_p0, %p2972_p2 }
 0xc14   : > { %p2970_p3 = pneg %p2969_p13 }
 0xc15   : > { %p2976_p1 = por %p2975_p10, %p2974_p8 }
 0xc17   : > { %p2977_p4 = pnand %p2976_p1, %p2970_p3 }
 0xc19   : > { %2980 = shalt.err (!%p2977_p4)
}
 0xc1a   : > { %2690 = dma.vmem_to_hbm [thread:$0]  (%p3780_p12), %s3663_s27, 128, %s3661_s22, %s2337_s16  }
 0xc1b PF: > { %s3781_s9 = sld [smem:[#allocation21_spill]]  ;;  %s3782_s12 = sld [smem:[#allocation17_spill]] }
 0xc1c   : > { %s3783_s13 = sld [smem:[#allocation25_spill]] }
 0xc21   : > { %p2717_p5 = scmp.ge.s32.totalorder %s3781_s9, 2  ;;  %s2364_s21 = sand.u32 1, %s3782_s12  }
 0xc22   : > { %p3784_p6 = scmp.ne.s32.totalorder %s3783_s13, 0  ;;  %s2365_s17 = scalar_lea.sflag [#allocation6], %s2364_s21 }
 0xc24   : > { %p2706_p7 = pnand %p2717_p5, %p3784_p6 }
 0xc26   : > { %3026 = dma.done.wait (!%p2706_p7), %s2365_s17, 128  }
 0xc27   : > { %3028 = vsyncadd (!%p2706_p7), %s2365_s17, 4294967168  ;;  %s30_s20 = sadd.s32 1, %s3781_s9   ;;  %s3785_s26 = sld [smem:[#allocation18_spill]] }
 0xc28   : > { %p27_p9 = scmp.ge.s32.totalorder %s30_s20, 6   ;;  %s3786_s15 = sld [smem:[#allocation26_spill]] }
 0xc29   : > { %s3787_s16 = sld [smem:[#allocation19_spill]]  ;;  %s3788_s17 = sld [smem:[#allocation20_spill]] }
 0xc2a   : > { %s3789_s18 = sld [smem:[#allocation22_spill]]  ;;  %s3790_s19 = sld [smem:[#allocation24_spill]] }
 0xc2b   : > { %s3791_s29 = smov %s3035_s30  ;;  %29 = sbr.rel (!%p27_p9) target bundleno = 14 (0xe), region = 133 }
 0xc2d   : > { %s3792_s30 = smov %s3785_s26 }
 0xc32   :  { %2370 = vsyncpa [#allocation5], 1 }
 0xc33   :  { %2372 = vsyncpa [#allocation5 + $0x1], 1 }
 0xc34   :  { %2373 = vsyncpa [#allocation8], 1 }
 0xc35   :  { %2374 = vsyncpa [#allocation11], 1 }
 0xc36   :  { %2375 = vsyncpa [#allocation6], 1 }
 0xc37   :  { %2377 = vsyncpa [#allocation6 + $0x1], 1 }

</bundles_post_ra>
